<compile_context>
chip_gen: v7x
topology: tpu7x:2x2x1
jax: 0.10.0
libtpu: 0.0.40
codegen_flags: <defaults>
</compile_context>

<pallas_src>
import functools

import jax
import jax.numpy as jnp
from jax import lax
from jax.experimental import pallas as pl
from jax.experimental.pallas import tpu as pltpu


# ----------------------------------------------------------------------------
# Pallas kernel
# ----------------------------------------------------------------------------
def _lstm_kernel(num_layers, hidden_size, t_block, unroll, hoist_weights, *refs):
    # refs layout:
    #   refs[0]                     : zx0_ref   (Tt, BB, 4H)  streamed x*Wx0 + b0 block
    #   refs[1]                     : Wh0_ref   (H, 4H)       layer-0 recurrent weight
    #   refs[2 + 3*(l-1) + 0]       : Wx_ref    (H, 4H)       l = 1..L-1
    #   refs[2 + 3*(l-1) + 1]       : Wh_ref    (H, 4H)
    #   refs[2 + 3*(l-1) + 2]       : b_ref     (1, 4H)
    #   refs[2 + 3*(L-1)]           : Wfc_ref   (H, O_pad)
    #   refs[3 + 3*(L-1)]           : bfc_ref   (1, O_pad)
    #   refs[4 + 3*(L-1)]           : out_ref   (BB, O_pad)
    #   refs[5 + 3*(L-1):]          : scratch   h_refs (L) + c_refs (L), each (BB, H)
    L, H, Tt = num_layers, hidden_size, t_block
    G = 4 * H

    zx0_ref = refs[0]
    wh0_ref = refs[1]
    layer_refs = refs[2:2 + 3 * (L - 1)]
    wfc_ref = refs[2 + 3 * (L - 1)]
    bfc_ref = refs[3 + 3 * (L - 1)]
    out_ref = refs[4 + 3 * (L - 1)]
    scratch = refs[5 + 3 * (L - 1):]
    h_refs = scratch[:L]
    c_refs = scratch[L:2 * L]

    t_idx = pl.program_id(1)
    n_t = pl.num_programs(1)

    # Reset the carried state at the first time block of each batch block.
    @pl.when(t_idx == 0)
    def _init():
        for l in range(L):
            h_refs[l][...] = jnp.zeros_like(h_refs[l])
            c_refs[l][...] = jnp.zeros_like(c_refs[l])

    # Per-lane activation constants (hoisted out of the time loop):
    #   sigmoid(x) = 0.5 * (1 + tanh(x / 2)) on the i/f/o lanes, plain tanh on g lanes,
    # so one full-width tanh per cell replaces tanh + sigmoid.
    lane = lax.broadcasted_iota(jnp.int32, (1, G), 1)
    is_g = (lane >= 2 * H) & (lane < 3 * H)
    scale = jnp.where(is_g, 1.0, 0.5).astype(jnp.float32)   # pre-scale == post-scale
    shift = jnp.where(is_g, 0.0, 0.5).astype(jnp.float32)

    # Hoisted per-layer biases (one (1, 4H) vreg each) and, for small footprints,
    # the layer weights themselves.
    bias = [layer_refs[3 * (l - 1) + 2][...] for l in range(1, L)]
    if hoist_weights:
        wh0_v = wh0_ref[...]
        w_v = [(layer_refs[3 * (l - 1)][...], layer_refs[3 * (l - 1) + 1][...])
               for l in range(1, L)]

    def cell(z, c_prev):
        # One full-width tanh on the (B, 4H) vreg; per-lane affine recovers sigmoid.
        act = jnp.tanh(z * scale) * scale + shift
        # TODO(synk): for H < 128 these quarter-lane slices run the VPU at 25% lane
        # occupancy; a (4B, H) sublane-packed gate layout would remove the shuffles.
        i_g = act[:, 0 * H:1 * H]
        f_g = act[:, 1 * H:2 * H]
        g_g = act[:, 2 * H:3 * H]
        o_g = act[:, 3 * H:4 * H]
        c_new = f_g * c_prev + i_g * g_g
        h_new = o_g * jnp.tanh(c_new)
        return h_new, c_new

    def step(t, carry):
        h, c = carry
        h = list(h)
        c = list(c)

        # Layer 0: input projection (x*Wx0 + b0) precomputed & streamed in as zx0.
        w0 = wh0_v if hoist_weights else wh0_ref[...]
        z0 = zx0_ref[t] + jnp.dot(h[0], w0, preferred_element_type=jnp.float32)
        h[0], c[0] = cell(z0, c[0])

        # Layers 1..L-1: two accumulating dots (no lane concatenate on the chain).
        for l in range(1, L):
            if hoist_weights:
                wx, wh = w_v[l - 1]
            else:
                wx = layer_refs[3 * (l - 1)][...]
                wh = layer_refs[3 * (l - 1) + 1][...]
            # TODO(synk): bf16 weight/h MXU inputs would cut MXU passes ~3x; kept f32
            # to preserve tight parity with the f32 reference.
            z = (jnp.dot(h[l - 1], wx, preferred_element_type=jnp.float32)
                 + jnp.dot(h[l], wh, preferred_element_type=jnp.float32)
                 + bias[l - 1])
            h[l], c[l] = cell(z, c[l])
        return tuple(h), tuple(c)

    h0 = tuple(h_refs[l][...] for l in range(L))
    c0 = tuple(c_refs[l][...] for l in range(L))
    h, c = lax.fori_loop(0, Tt, step, (h0, c0), unroll=unroll)

    # Carry state to the next time block.
    for l in range(L):
        h_refs[l][...] = h[l]
        c_refs[l][...] = c[l]

    # Final FC projection only at the last time block (output block is VMEM-resident
    # across the time axis).
    @pl.when(t_idx == n_t - 1)
    def _finalize():
        out = jnp.dot(h[L - 1], wfc_ref[...],
                      preferred_element_type=jnp.float32) + bfc_ref[...]
        out_ref[...] = out.astype(out_ref.dtype)


# ----------------------------------------------------------------------------
# Wrapper
# ----------------------------------------------------------------------------
def _largest_divisor_leq(n, cap):
    for d in range(min(n, cap), 0, -1):
        if n % d == 0:
            return d
    return 1


def lstm_forward(x, params, *, hidden_size, num_layers, output_size):
    """x: (B, T) float32 — matches the PyTorch forward where the feature dim is 1."""
    B, T = x.shape
    H = hidden_size
    L = num_layers
    G = 4 * H

    # Pad batch to full sublanes and FC output features to full lanes.
    B_pad = max(8, ((B + 7) // 8) * 8)
    O_pad = max(128, ((output_size + 127) // 128) * 128)

    # Batch blocking: 8-row blocks once the padded batch allows it, so the "parallel"
    # batch axis actually shards across v7x's two TensorCores for real batches.
    BB = 8 if B_pad >= 16 else B_pad

    # Time blocking: stream zx0 in (Tt, BB, 4H) blocks; h/c carried in VMEM scratch.
    Tt = _largest_divisor_leq(T, 32)
    if Tt <= 16:
        unroll = True
    elif Tt % 8 == 0:
        unroll = 8
    elif Tt % 4 == 0:
        unroll = 4
    else:
        unroll = True

    x_pad = jnp.zeros((B_pad, T), jnp.float32).at[:B, :].set(x.astype(jnp.float32))

    # Precompute the layer-0 input projection for the whole sequence (lane-dense):
    #   zx0[t, b, :] = x[b, t] * Wx0 + b0
    # TODO(synk): for very large H*T compute z0 in-kernel from raw x (rank-1 broadcast)
    # to avoid the 4H-times HBM blowup; the T-grid streaming below at least hides it.
    Wx0, Wh0, b0 = params["layers"][0]
    zx0 = x_pad.T[:, :, None] * Wx0.reshape(1, 1, G) + b0.reshape(1, 1, G)

    flat = [zx0, Wh0]
    for l in range(1, L):
        Wx_l, Wh_l, b_l = params["layers"][l]
        flat += [Wx_l, Wh_l, b_l]

    Wfc_pad = jnp.zeros((H, O_pad), jnp.float32).at[:, :output_size].set(params["Wfc"])
    bfc_pad = jnp.zeros((1, O_pad), jnp.float32).at[:, :output_size].set(params["bfc"])
    flat += [Wfc_pad, bfc_pad]

    # Hoist weights into vregs only when the footprint is comfortably small.
    weight_bytes = 4 * (H * G + (L - 1) * 2 * H * G)
    hoist_weights = weight_bytes <= 64 * 1024

    kernel = functools.partial(_lstm_kernel, L, H, Tt, unroll, hoist_weights)

    grid = (B_pad // BB, T // Tt)

    in_specs = [pl.BlockSpec((Tt, BB, G), lambda b, t: (t, b, 0))]   # zx0 (streamed)
    in_specs.append(pl.BlockSpec((H, G), lambda b, t: (0, 0)))       # Wh0
    for _ in range(1, L):
        in_specs.append(pl.BlockSpec((H, G), lambda b, t: (0, 0)))   # Wx_l
        in_specs.append(pl.BlockSpec((H, G), lambda b, t: (0, 0)))   # Wh_l
        in_specs.append(pl.BlockSpec((1, G), lambda b, t: (0, 0)))   # b_l
    in_specs.append(pl.BlockSpec((H, O_pad), lambda b, t: (0, 0)))   # Wfc
    in_specs.append(pl.BlockSpec((1, O_pad), lambda b, t: (0, 0)))   # bfc

    out_spec = pl.BlockSpec((BB, O_pad), lambda b, t: (b, 0))

    scratch_shapes = [pltpu.VMEM((BB, H), jnp.float32) for _ in range(2 * L)]

    # VMEM budget: double-buffered zx0 block + weights (x2) + output block + scratch.
    zx0_block = Tt * BB * G * 4
    w_bytes = sum(int(a.size) * 4 for a in flat[1:])
    est = 2 * zx0_block + 2 * w_bytes + 2 * BB * O_pad * 4 + 2 * L * BB * H * 4
    vmem_limit = int(min(max(2 * est, 32 << 20), 64 << 20))

    out_pad = pl.pallas_call(
        kernel,
        out_shape=jax.ShapeDtypeStruct((B_pad, O_pad), jnp.float32),
        grid=grid,
        in_specs=in_specs,
        out_specs=out_spec,
        scratch_shapes=scratch_shapes,
        compiler_params=pltpu.CompilerParams(
            dimension_semantics=("parallel", "arbitrary"),
            vmem_limit_bytes=vmem_limit),
    )(*flat)

    return out_pad[:B, :output_size]


# ----------------------------------------------------------------------------
# Deterministic parameter construction (PyTorch-Linear-style uniform init)
# ----------------------------------------------------------------------------
def make_params(key, hidden_size, output_size, num_layers):
    H = hidden_size

    def linear(key, fan_in, fan_out):
        kw, kb = jax.random.split(key)
        bound = 1.0 / jnp.sqrt(jnp.float32(fan_in))
        w = jax.random.uniform(kw, (fan_in, fan_out), jnp.float32, -bound, bound)
        b = jax.random.uniform(kb, (fan_out,), jnp.float32, -bound, bound)
        return w, b

    layers = []
    for l in range(num_layers):
        in_dim = 1 if l == 0 else H
        key, *ks = jax.random.split(key, 9)
        # gate order: i, f, g, o
        wxs, bxs, whs, bhs = [], [], [], []
        for g in range(4):
            wx, bx = linear(ks[2 * g], in_dim, H)
            wh, bh = linear(ks[2 * g + 1], H, H)
            wxs.append(wx); bxs.append(bx); whs.append(wh); bhs.append(bh)
        Wx_l = jnp.concatenate(wxs, axis=1)                            # (in_dim, 4H)
        Wh_l = jnp.concatenate(whs, axis=1)                            # (H, 4H)
        b_l = (jnp.concatenate(bxs) + jnp.concatenate(bhs))[None, :]   # (1, 4H)
        layers.append((Wx_l, Wh_l, b_l))

    key, kfc = jax.random.split(key)
    Wfc, bfc = linear(kfc, H, output_size)
    return {"layers": layers, "Wfc": Wfc, "bfc": bfc[None, :]}


# ----------------------------------------------------------------------------
# Pure-JAX reference (mirrors the PyTorch forward exactly)
# ----------------------------------------------------------------------------
def lstm_reference(x, params, *, hidden_size, num_layers):
    B, T = x.shape
    H = hidden_size
    h = [jnp.zeros((B, H), jnp.float32) for _ in range(num_layers)]
    c = [jnp.zeros((B, H), jnp.float32) for _ in range(num_layers)]
    for t in range(T):
        for l in range(num_layers):
            inp = x[:, t][:, None] if l == 0 else h[l - 1]
            Wx_l, Wh_l, b_l = params["layers"][l]
            z = inp @ Wx_l + h[l] @ Wh_l + b_l
            i = jax.nn.sigmoid(z[:, 0 * H:1 * H])
            f = jax.nn.sigmoid(z[:, 1 * H:2 * H])
            g = jnp.tanh(z[:, 2 * H:3 * H])
            o = jax.nn.sigmoid(z[:, 3 * H:4 * H])
            c[l] = f * c[l] + i * g
            h[l] = o * jnp.tanh(c[l])
    return h[-1] @ params["Wfc"] + params["bfc"]


# ----------------------------------------------------------------------------
if __name__ == "__main__":
    batch, seq_len = 2, 8
    hidden_size, output_size, num_layers = 32, 4, 2

    key = jax.random.PRNGKey(0)
    kx, kp = jax.random.split(key)
    x = jax.random.normal(kx, (batch, seq_len), jnp.float32)
    params = make_params(kp, hidden_size, output_size, num_layers)

    out = lstm_forward(x, params, hidden_size=hidden_size,
                       num_layers=num_layers, output_size=output_size)
    out = jax.block_until_ready(out)

    ref = lstm_reference(x, params, hidden_size=hidden_size, num_layers=num_layers)
    assert out.shape == (batch, output_size)
    assert jnp.allclose(out, ref, rtol=1e-4, atol=1e-4), (out, ref)

    print("KERNEL_OK")
</pallas_src>

<mosaic_0001>
module attributes {stable_mosaic.version = 11 : i64} {
  func.func @_lstm_kernel(%arg0: i32, %arg1: i32, %arg2: memref<8x8x128xf32, #tpu.memory_space<vmem>>, %arg3: memref<32x128xf32, #tpu.memory_space<vmem>>, %arg4: memref<32x128xf32, #tpu.memory_space<vmem>>, %arg5: memref<32x128xf32, #tpu.memory_space<vmem>>, %arg6: memref<1x128xf32, #tpu.memory_space<vmem>>, %arg7: memref<32x128xf32, #tpu.memory_space<vmem>>, %arg8: memref<1x128xf32, #tpu.memory_space<vmem>>, %arg9: memref<8x128xf32, #tpu.memory_space<vmem>>, %arg10: memref<8x32xf32, #tpu.memory_space<vmem>>, %arg11: memref<8x32xf32, #tpu.memory_space<vmem>>, %arg12: memref<8x32xf32, #tpu.memory_space<vmem>>, %arg13: memref<8x32xf32, #tpu.memory_space<vmem>>) attributes {dimension_semantics = [#tpu.dimension_semantics<parallel>, #tpu.dimension_semantics<arbitrary>], iteration_bounds = array<i64: 1, 1>, scalar_prefetch = 0 : i64, scratch_operands = 4 : i64, tpu.core_type = #tpu.core_type<tc>, window_params = [{transform_indices = @transform_0, window_bounds = array<i64: 8, 8, 128>}, {pipeline_mode = #tpu.pipeline_mode<synchronous>, transform_indices = @transform_1, window_bounds = array<i64: 32, 128>}, {pipeline_mode = #tpu.pipeline_mode<synchronous>, transform_indices = @transform_2, window_bounds = array<i64: 32, 128>}, {pipeline_mode = #tpu.pipeline_mode<synchronous>, transform_indices = @transform_3, window_bounds = array<i64: 32, 128>}, {pipeline_mode = #tpu.pipeline_mode<synchronous>, transform_indices = @transform_4, window_bounds = array<i64: 1, 128>}, {pipeline_mode = #tpu.pipeline_mode<synchronous>, transform_indices = @transform_5, window_bounds = array<i64: 32, 128>}, {pipeline_mode = #tpu.pipeline_mode<synchronous>, transform_indices = @transform_6, window_bounds = array<i64: 1, 128>}, {transform_indices = @transform_7, window_bounds = array<i64: 8, 128>}]} {
    %c0_i32 = arith.constant 0 : i32
    %0 = arith.cmpi eq, %arg1, %c0_i32 : i32
    %1 = arith.extui %0 : i1 to i32
    %c0_i32_0 = arith.constant 0 : i32
    %2 = arith.cmpi ne, %1, %c0_i32_0 : i32
    scf.if %2 {
      %cst_70 = arith.constant 0.000000e+00 : f32
      %366 = vector.broadcast %cst_70 : f32 to vector<8x32xf32>
      %c0_71 = arith.constant 0 : index
      %c0_72 = arith.constant 0 : index
      %367 = vector.load %arg10[%c0_71, %c0_72] : memref<8x32xf32, #tpu.memory_space<vmem>>, vector<8x32xf32>
      tpu.vector_store %arg10[%c0_71, %c0_72], %366 {strides = array<i32>} : memref<8x32xf32, #tpu.memory_space<vmem>>, vector<8x32xf32>,
      %cst_73 = arith.constant 0.000000e+00 : f32
      %368 = vector.broadcast %cst_73 : f32 to vector<8x32xf32>
      %c0_74 = arith.constant 0 : index
      %c0_75 = arith.constant 0 : index
      %369 = vector.load %arg12[%c0_74, %c0_75] : memref<8x32xf32, #tpu.memory_space<vmem>>, vector<8x32xf32>
      tpu.vector_store %arg12[%c0_74, %c0_75], %368 {strides = array<i32>} : memref<8x32xf32, #tpu.memory_space<vmem>>, vector<8x32xf32>,
      %cst_76 = arith.constant 0.000000e+00 : f32
      %370 = vector.broadcast %cst_76 : f32 to vector<8x32xf32>
      %c0_77 = arith.constant 0 : index
      %c0_78 = arith.constant 0 : index
      %371 = vector.load %arg11[%c0_77, %c0_78] : memref<8x32xf32, #tpu.memory_space<vmem>>, vector<8x32xf32>
      tpu.vector_store %arg11[%c0_77, %c0_78], %370 {strides = array<i32>} : memref<8x32xf32, #tpu.memory_space<vmem>>, vector<8x32xf32>,
      %cst_79 = arith.constant 0.000000e+00 : f32
      %372 = vector.broadcast %cst_79 : f32 to vector<8x32xf32>
      %c0_80 = arith.constant 0 : index
      %c0_81 = arith.constant 0 : index
      %373 = vector.load %arg13[%c0_80, %c0_81] : memref<8x32xf32, #tpu.memory_space<vmem>>, vector<8x32xf32>
      tpu.vector_store %arg13[%c0_80, %c0_81], %372 {strides = array<i32>} : memref<8x32xf32, #tpu.memory_space<vmem>>, vector<8x32xf32>,
    } else {
    }
    %3 = tpu.iota {dimensions = array<i32: 1>} : vector<1x128xi32>
    %c64_i32 = arith.constant 64 : i32
    %4 = vector.broadcast %c64_i32 : i32 to vector<1x128xi32>
    %5 = arith.cmpi sge, %3, %4 : vector<1x128xi32>
    %c96_i32 = arith.constant 96 : i32
    %6 = vector.broadcast %c96_i32 : i32 to vector<1x128xi32>
    %7 = arith.cmpi slt, %3, %6 : vector<1x128xi32>
    %8 = arith.andi %5, %7 : vector<1x128xi1>
    %cst = arith.constant 1.000000e+00 : f32
    %cst_1 = arith.constant 5.000000e-01 : f32
    %9 = vector.broadcast %cst : f32 to vector<1x128xf32>
    %10 = vector.broadcast %cst_1 : f32 to vector<1x128xf32>
    %11 = arith.select %8, %9, %10 : vector<1x128xi1>, vector<1x128xf32>
    %cst_2 = arith.constant 0.000000e+00 : f32
    %cst_3 = arith.constant 5.000000e-01 : f32
    %12 = vector.broadcast %cst_2 : f32 to vector<1x128xf32>
    %13 = vector.broadcast %cst_3 : f32 to vector<1x128xf32>
    %14 = arith.select %8, %12, %13 : vector<1x128xi1>, vector<1x128xf32>
    %c0 = arith.constant 0 : index
    %c0_4 = arith.constant 0 : index
    %15 = vector.load %arg6[%c0, %c0_4] : memref<1x128xf32, #tpu.memory_space<vmem>>, vector<1x128xf32>
    %c0_5 = arith.constant 0 : index
    %c0_6 = arith.constant 0 : index
    %16 = vector.load %arg3[%c0_5, %c0_6] : memref<32x128xf32, #tpu.memory_space<vmem>>, vector<32x128xf32>
    %c0_7 = arith.constant 0 : index
    %c0_8 = arith.constant 0 : index
    %17 = vector.load %arg4[%c0_7, %c0_8] : memref<32x128xf32, #tpu.memory_space<vmem>>, vector<32x128xf32>
    %c0_9 = arith.constant 0 : index
    %c0_10 = arith.constant 0 : index
    %18 = vector.load %arg5[%c0_9, %c0_10] : memref<32x128xf32, #tpu.memory_space<vmem>>, vector<32x128xf32>
    %c0_11 = arith.constant 0 : index
    %c0_12 = arith.constant 0 : index
    %19 = vector.load %arg10[%c0_11, %c0_12] : memref<8x32xf32, #tpu.memory_space<vmem>>, vector<8x32xf32>
    %c0_13 = arith.constant 0 : index
    %c0_14 = arith.constant 0 : index
    %20 = vector.load %arg11[%c0_13, %c0_14] : memref<8x32xf32, #tpu.memory_space<vmem>>, vector<8x32xf32>
    %c0_15 = arith.constant 0 : index
    %c0_16 = arith.constant 0 : index
    %21 = vector.load %arg12[%c0_15, %c0_16] : memref<8x32xf32, #tpu.memory_space<vmem>>, vector<8x32xf32>
    %c0_17 = arith.constant 0 : index
    %c0_18 = arith.constant 0 : index
    %22 = vector.load %arg13[%c0_17, %c0_18] : memref<8x32xf32, #tpu.memory_space<vmem>>, vector<8x32xf32>
    %c0_i32_19 = arith.constant 0 : i32
    %23 = arith.index_cast %c0_i32_19 : i32 to index
    %c0_20 = arith.constant 0 : index
    %c0_21 = arith.constant 0 : index
    %24 = vector.load %arg2[%23, %c0_20, %c0_21] : memref<8x8x128xf32, #tpu.memory_space<vmem>>, vector<1x8x128xf32>
    %25 = vector.shape_cast %24 : vector<1x8x128xf32> to vector<8x128xf32>
    %cst_22 = arith.constant dense<0.000000e+00> : vector<8x128xf32>
    %26 = tpu.matmul %19, %16, %cst_22 {dimension_numbers = #tpu.dot_dimension_numbers<[1], [0], [0], [1], [0, 0, 1, 1], [], []>} : vector<8x32xf32>, vector<32x128xf32>, vector<8x128xf32> -> vector<8x128xf32>
    %27 = arith.addf %25, %26 : vector<8x128xf32>
    %28 = vector.broadcast %11 : vector<1x128xf32> to vector<8x128xf32>
    %29 = arith.mulf %27, %28 : vector<8x128xf32>
    %30 = math.tanh %29 : vector<8x128xf32>
    %31 = vector.broadcast %11 : vector<1x128xf32> to vector<8x128xf32>
    %32 = arith.mulf %30, %31 : vector<8x128xf32>
    %33 = vector.broadcast %14 : vector<1x128xf32> to vector<8x128xf32>
    %34 = arith.addf %32, %33 : vector<8x128xf32>
    %35 = vector.extract_strided_slice %34 {offsets = [0, 0], sizes = [8, 32], strides = [1, 1]} : vector<8x128xf32> to vector<8x32xf32>
    %36 = vector.extract_strided_slice %34 {offsets = [0, 32], sizes = [8, 32], strides = [1, 1]} : vector<8x128xf32> to vector<8x32xf32>
    %37 = vector.extract_strided_slice %34 {offsets = [0, 64], sizes = [8, 32], strides = [1, 1]} : vector<8x128xf32> to vector<8x32xf32>
    %38 = vector.extract_strided_slice %34 {offsets = [0, 96], sizes = [8, 32], strides = [1, 1]} : vector<8x128xf32> to vector<8x32xf32>
    %39 = arith.mulf %36, %21 : vector<8x32xf32>
    %40 = arith.mulf %35, %37 : vector<8x32xf32>
    %41 = arith.addf %39, %40 : vector<8x32xf32>
    %42 = math.tanh %41 : vector<8x32xf32>
    %43 = arith.mulf %38, %42 : vector<8x32xf32>
    %cst_23 = arith.constant dense<0.000000e+00> : vector<8x128xf32>
    %44 = tpu.matmul %43, %17, %cst_23 {dimension_numbers = #tpu.dot_dimension_numbers<[1], [0], [0], [1], [0, 0, 1, 1], [], []>} : vector<8x32xf32>, vector<32x128xf32>, vector<8x128xf32> -> vector<8x128xf32>
    %cst_24 = arith.constant dense<0.000000e+00> : vector<8x128xf32>
    %45 = tpu.matmul %20, %18, %cst_24 {dimension_numbers = #tpu.dot_dimension_numbers<[1], [0], [0], [1], [0, 0, 1, 1], [], []>} : vector<8x32xf32>, vector<32x128xf32>, vector<8x128xf32> -> vector<8x128xf32>
    %46 = arith.addf %44, %45 : vector<8x128xf32>
    %47 = vector.broadcast %15 : vector<1x128xf32> to vector<8x128xf32>
    %48 = arith.addf %46, %47 : vector<8x128xf32>
    %49 = vector.broadcast %11 : vector<1x128xf32> to vector<8x128xf32>
    %50 = arith.mulf %48, %49 : vector<8x128xf32>
    %51 = math.tanh %50 : vector<8x128xf32>
    %52 = vector.broadcast %11 : vector<1x128xf32> to vector<8x128xf32>
    %53 = arith.mulf %51, %52 : vector<8x128xf32>
    %54 = vector.broadcast %14 : vector<1x128xf32> to vector<8x128xf32>
    %55 = arith.addf %53, %54 : vector<8x128xf32>
    %56 = vector.extract_strided_slice %55 {offsets = [0, 0], sizes = [8, 32], strides = [1, 1]} : vector<8x128xf32> to vector<8x32xf32>
    %57 = vector.extract_strided_slice %55 {offsets = [0, 32], sizes = [8, 32], strides = [1, 1]} : vector<8x128xf32> to vector<8x32xf32>
    %58 = vector.extract_strided_slice %55 {offsets = [0, 64], sizes = [8, 32], strides = [1, 1]} : vector<8x128xf32> to vector<8x32xf32>
    %59 = vector.extract_strided_slice %55 {offsets = [0, 96], sizes = [8, 32], strides = [1, 1]} : vector<8x128xf32> to vector<8x32xf32>
    %60 = arith.mulf %57, %22 : vector<8x32xf32>
    %61 = arith.mulf %56, %58 : vector<8x32xf32>
    %62 = arith.addf %60, %61 : vector<8x32xf32>
    %63 = math.tanh %62 : vector<8x32xf32>
    %64 = arith.mulf %59, %63 : vector<8x32xf32>
    %c1_i32 = arith.constant 1 : i32
    %65 = arith.index_cast %c1_i32 : i32 to index
    %c0_25 = arith.constant 0 : index
    %c0_26 = arith.constant 0 : index
    %66 = vector.load %arg2[%65, %c0_25, %c0_26] : memref<8x8x128xf32, #tpu.memory_space<vmem>>, vector<1x8x128xf32>
    %67 = vector.shape_cast %66 : vector<1x8x128xf32> to vector<8x128xf32>
    %cst_27 = arith.constant dense<0.000000e+00> : vector<8x128xf32>
    %68 = tpu.matmul %43, %16, %cst_27 {dimension_numbers = #tpu.dot_dimension_numbers<[1], [0], [0], [1], [0, 0, 1, 1], [], []>} : vector<8x32xf32>, vector<32x128xf32>, vector<8x128xf32> -> vector<8x128xf32>
    %69 = arith.addf %67, %68 : vector<8x128xf32>
    %70 = vector.broadcast %11 : vector<1x128xf32> to vector<8x128xf32>
    %71 = arith.mulf %69, %70 : vector<8x128xf32>
    %72 = math.tanh %71 : vector<8x128xf32>
    %73 = vector.broadcast %11 : vector<1x128xf32> to vector<8x128xf32>
    %74 = arith.mulf %72, %73 : vector<8x128xf32>
    %75 = vector.broadcast %14 : vector<1x128xf32> to vector<8x128xf32>
    %76 = arith.addf %74, %75 : vector<8x128xf32>
    %77 = vector.extract_strided_slice %76 {offsets = [0, 0], sizes = [8, 32], strides = [1, 1]} : vector<8x128xf32> to vector<8x32xf32>
    %78 = vector.extract_strided_slice %76 {offsets = [0, 32], sizes = [8, 32], strides = [1, 1]} : vector<8x128xf32> to vector<8x32xf32>
    %79 = vector.extract_strided_slice %76 {offsets = [0, 64], sizes = [8, 32], strides = [1, 1]} : vector<8x128xf32> to vector<8x32xf32>
    %80 = vector.extract_strided_slice %76 {offsets = [0, 96], sizes = [8, 32], strides = [1, 1]} : vector<8x128xf32> to vector<8x32xf32>
    %81 = arith.mulf %78, %41 : vector<8x32xf32>
    %82 = arith.mulf %77, %79 : vector<8x32xf32>
    %83 = arith.addf %81, %82 : vector<8x32xf32>
    %84 = math.tanh %83 : vector<8x32xf32>
    %85 = arith.mulf %80, %84 : vector<8x32xf32>
    %cst_28 = arith.constant dense<0.000000e+00> : vector<8x128xf32>
    %86 = tpu.matmul %85, %17, %cst_28 {dimension_numbers = #tpu.dot_dimension_numbers<[1], [0], [0], [1], [0, 0, 1, 1], [], []>} : vector<8x32xf32>, vector<32x128xf32>, vector<8x128xf32> -> vector<8x128xf32>
    %cst_29 = arith.constant dense<0.000000e+00> : vector<8x128xf32>
    %87 = tpu.matmul %64, %18, %cst_29 {dimension_numbers = #tpu.dot_dimension_numbers<[1], [0], [0], [1], [0, 0, 1, 1], [], []>} : vector<8x32xf32>, vector<32x128xf32>, vector<8x128xf32> -> vector<8x128xf32>
    %88 = arith.addf %86, %87 : vector<8x128xf32>
    %89 = vector.broadcast %15 : vector<1x128xf32> to vector<8x128xf32>
    %90 = arith.addf %88, %89 : vector<8x128xf32>
    %91 = vector.broadcast %11 : vector<1x128xf32> to vector<8x128xf32>
    %92 = arith.mulf %90, %91 : vector<8x128xf32>
    %93 = math.tanh %92 : vector<8x128xf32>
    %94 = vector.broadcast %11 : vector<1x128xf32> to vector<8x128xf32>
    %95 = arith.mulf %93, %94 : vector<8x128xf32>
    %96 = vector.broadcast %14 : vector<1x128xf32> to vector<8x128xf32>
    %97 = arith.addf %95, %96 : vector<8x128xf32>
    %98 = vector.extract_strided_slice %97 {offsets = [0, 0], sizes = [8, 32], strides = [1, 1]} : vector<8x128xf32> to vector<8x32xf32>
    %99 = vector.extract_strided_slice %97 {offsets = [0, 32], sizes = [8, 32], strides = [1, 1]} : vector<8x128xf32> to vector<8x32xf32>
    %100 = vector.extract_strided_slice %97 {offsets = [0, 64], sizes = [8, 32], strides = [1, 1]} : vector<8x128xf32> to vector<8x32xf32>
    %101 = vector.extract_strided_slice %97 {offsets = [0, 96], sizes = [8, 32], strides = [1, 1]} : vector<8x128xf32> to vector<8x32xf32>
    %102 = arith.mulf %99, %62 : vector<8x32xf32>
    %103 = arith.mulf %98, %100 : vector<8x32xf32>
    %104 = arith.addf %102, %103 : vector<8x32xf32>
    %105 = math.tanh %104 : vector<8x32xf32>
    %106 = arith.mulf %101, %105 : vector<8x32xf32>
    %c2_i32 = arith.constant 2 : i32
    %107 = arith.index_cast %c2_i32 : i32 to index
    %c0_30 = arith.constant 0 : index
    %c0_31 = arith.constant 0 : index
    %108 = vector.load %arg2[%107, %c0_30, %c0_31] : memref<8x8x128xf32, #tpu.memory_space<vmem>>, vector<1x8x128xf32>
    %109 = vector.shape_cast %108 : vector<1x8x128xf32> to vector<8x128xf32>
    %cst_32 = arith.constant dense<0.000000e+00> : vector<8x128xf32>
    %110 = tpu.matmul %85, %16, %cst_32 {dimension_numbers = #tpu.dot_dimension_numbers<[1], [0], [0], [1], [0, 0, 1, 1], [], []>} : vector<8x32xf32>, vector<32x128xf32>, vector<8x128xf32> -> vector<8x128xf32>
    %111 = arith.addf %109, %110 : vector<8x128xf32>
    %112 = vector.broadcast %11 : vector<1x128xf32> to vector<8x128xf32>
    %113 = arith.mulf %111, %112 : vector<8x128xf32>
    %114 = math.tanh %113 : vector<8x128xf32>
    %115 = vector.broadcast %11 : vector<1x128xf32> to vector<8x128xf32>
    %116 = arith.mulf %114, %115 : vector<8x128xf32>
    %117 = vector.broadcast %14 : vector<1x128xf32> to vector<8x128xf32>
    %118 = arith.addf %116, %117 : vector<8x128xf32>
    %119 = vector.extract_strided_slice %118 {offsets = [0, 0], sizes = [8, 32], strides = [1, 1]} : vector<8x128xf32> to vector<8x32xf32>
    %120 = vector.extract_strided_slice %118 {offsets = [0, 32], sizes = [8, 32], strides = [1, 1]} : vector<8x128xf32> to vector<8x32xf32>
    %121 = vector.extract_strided_slice %118 {offsets = [0, 64], sizes = [8, 32], strides = [1, 1]} : vector<8x128xf32> to vector<8x32xf32>
    %122 = vector.extract_strided_slice %118 {offsets = [0, 96], sizes = [8, 32], strides = [1, 1]} : vector<8x128xf32> to vector<8x32xf32>
    %123 = arith.mulf %120, %83 : vector<8x32xf32>
    %124 = arith.mulf %119, %121 : vector<8x32xf32>
    %125 = arith.addf %123, %124 : vector<8x32xf32>
    %126 = math.tanh %125 : vector<8x32xf32>
    %127 = arith.mulf %122, %126 : vector<8x32xf32>
    %cst_33 = arith.constant dense<0.000000e+00> : vector<8x128xf32>
    %128 = tpu.matmul %127, %17, %cst_33 {dimension_numbers = #tpu.dot_dimension_numbers<[1], [0], [0], [1], [0, 0, 1, 1], [], []>} : vector<8x32xf32>, vector<32x128xf32>, vector<8x128xf32> -> vector<8x128xf32>
    %cst_34 = arith.constant dense<0.000000e+00> : vector<8x128xf32>
    %129 = tpu.matmul %106, %18, %cst_34 {dimension_numbers = #tpu.dot_dimension_numbers<[1], [0], [0], [1], [0, 0, 1, 1], [], []>} : vector<8x32xf32>, vector<32x128xf32>, vector<8x128xf32> -> vector<8x128xf32>
    %130 = arith.addf %128, %129 : vector<8x128xf32>
    %131 = vector.broadcast %15 : vector<1x128xf32> to vector<8x128xf32>
    %132 = arith.addf %130, %131 : vector<8x128xf32>
    %133 = vector.broadcast %11 : vector<1x128xf32> to vector<8x128xf32>
    %134 = arith.mulf %132, %133 : vector<8x128xf32>
    %135 = math.tanh %134 : vector<8x128xf32>
    %136 = vector.broadcast %11 : vector<1x128xf32> to vector<8x128xf32>
    %137 = arith.mulf %135, %136 : vector<8x128xf32>
    %138 = vector.broadcast %14 : vector<1x128xf32> to vector<8x128xf32>
    %139 = arith.addf %137, %138 : vector<8x128xf32>
    %140 = vector.extract_strided_slice %139 {offsets = [0, 0], sizes = [8, 32], strides = [1, 1]} : vector<8x128xf32> to vector<8x32xf32>
    %141 = vector.extract_strided_slice %139 {offsets = [0, 32], sizes = [8, 32], strides = [1, 1]} : vector<8x128xf32> to vector<8x32xf32>
    %142 = vector.extract_strided_slice %139 {offsets = [0, 64], sizes = [8, 32], strides = [1, 1]} : vector<8x128xf32> to vector<8x32xf32>
    %143 = vector.extract_strided_slice %139 {offsets = [0, 96], sizes = [8, 32], strides = [1, 1]} : vector<8x128xf32> to vector<8x32xf32>
    %144 = arith.mulf %141, %104 : vector<8x32xf32>
    %145 = arith.mulf %140, %142 : vector<8x32xf32>
    %146 = arith.addf %144, %145 : vector<8x32xf32>
    %147 = math.tanh %146 : vector<8x32xf32>
    %148 = arith.mulf %143, %147 : vector<8x32xf32>
    %c3_i32 = arith.constant 3 : i32
    %149 = arith.index_cast %c3_i32 : i32 to index
    %c0_35 = arith.constant 0 : index
    %c0_36 = arith.constant 0 : index
    %150 = vector.load %arg2[%149, %c0_35, %c0_36] : memref<8x8x128xf32, #tpu.memory_space<vmem>>, vector<1x8x128xf32>
    %151 = vector.shape_cast %150 : vector<1x8x128xf32> to vector<8x128xf32>
    %cst_37 = arith.constant dense<0.000000e+00> : vector<8x128xf32>
    %152 = tpu.matmul %127, %16, %cst_37 {dimension_numbers = #tpu.dot_dimension_numbers<[1], [0], [0], [1], [0, 0, 1, 1], [], []>} : vector<8x32xf32>, vector<32x128xf32>, vector<8x128xf32> -> vector<8x128xf32>
    %153 = arith.addf %151, %152 : vector<8x128xf32>
    %154 = vector.broadcast %11 : vector<1x128xf32> to vector<8x128xf32>
    %155 = arith.mulf %153, %154 : vector<8x128xf32>
    %156 = math.tanh %155 : vector<8x128xf32>
    %157 = vector.broadcast %11 : vector<1x128xf32> to vector<8x128xf32>
    %158 = arith.mulf %156, %157 : vector<8x128xf32>
    %159 = vector.broadcast %14 : vector<1x128xf32> to vector<8x128xf32>
    %160 = arith.addf %158, %159 : vector<8x128xf32>
    %161 = vector.extract_strided_slice %160 {offsets = [0, 0], sizes = [8, 32], strides = [1, 1]} : vector<8x128xf32> to vector<8x32xf32>
    %162 = vector.extract_strided_slice %160 {offsets = [0, 32], sizes = [8, 32], strides = [1, 1]} : vector<8x128xf32> to vector<8x32xf32>
    %163 = vector.extract_strided_slice %160 {offsets = [0, 64], sizes = [8, 32], strides = [1, 1]} : vector<8x128xf32> to vector<8x32xf32>
    %164 = vector.extract_strided_slice %160 {offsets = [0, 96], sizes = [8, 32], strides = [1, 1]} : vector<8x128xf32> to vector<8x32xf32>
    %165 = arith.mulf %162, %125 : vector<8x32xf32>
    %166 = arith.mulf %161, %163 : vector<8x32xf32>
    %167 = arith.addf %165, %166 : vector<8x32xf32>
    %168 = math.tanh %167 : vector<8x32xf32>
    %169 = arith.mulf %164, %168 : vector<8x32xf32>
    %cst_38 = arith.constant dense<0.000000e+00> : vector<8x128xf32>
    %170 = tpu.matmul %169, %17, %cst_38 {dimension_numbers = #tpu.dot_dimension_numbers<[1], [0], [0], [1], [0, 0, 1, 1], [], []>} : vector<8x32xf32>, vector<32x128xf32>, vector<8x128xf32> -> vector<8x128xf32>
    %cst_39 = arith.constant dense<0.000000e+00> : vector<8x128xf32>
    %171 = tpu.matmul %148, %18, %cst_39 {dimension_numbers = #tpu.dot_dimension_numbers<[1], [0], [0], [1], [0, 0, 1, 1], [], []>} : vector<8x32xf32>, vector<32x128xf32>, vector<8x128xf32> -> vector<8x128xf32>
    %172 = arith.addf %170, %171 : vector<8x128xf32>
    %173 = vector.broadcast %15 : vector<1x128xf32> to vector<8x128xf32>
    %174 = arith.addf %172, %173 : vector<8x128xf32>
    %175 = vector.broadcast %11 : vector<1x128xf32> to vector<8x128xf32>
    %176 = arith.mulf %174, %175 : vector<8x128xf32>
    %177 = math.tanh %176 : vector<8x128xf32>
    %178 = vector.broadcast %11 : vector<1x128xf32> to vector<8x128xf32>
    %179 = arith.mulf %177, %178 : vector<8x128xf32>
    %180 = vector.broadcast %14 : vector<1x128xf32> to vector<8x128xf32>
    %181 = arith.addf %179, %180 : vector<8x128xf32>
    %182 = vector.extract_strided_slice %181 {offsets = [0, 0], sizes = [8, 32], strides = [1, 1]} : vector<8x128xf32> to vector<8x32xf32>
    %183 = vector.extract_strided_slice %181 {offsets = [0, 32], sizes = [8, 32], strides = [1, 1]} : vector<8x128xf32> to vector<8x32xf32>
    %184 = vector.extract_strided_slice %181 {offsets = [0, 64], sizes = [8, 32], strides = [1, 1]} : vector<8x128xf32> to vector<8x32xf32>
    %185 = vector.extract_strided_slice %181 {offsets = [0, 96], sizes = [8, 32], strides = [1, 1]} : vector<8x128xf32> to vector<8x32xf32>
    %186 = arith.mulf %183, %146 : vector<8x32xf32>
    %187 = arith.mulf %182, %184 : vector<8x32xf32>
    %188 = arith.addf %186, %187 : vector<8x32xf32>
    %189 = math.tanh %188 : vector<8x32xf32>
    %190 = arith.mulf %185, %189 : vector<8x32xf32>
    %c4_i32 = arith.constant 4 : i32
    %191 = arith.index_cast %c4_i32 : i32 to index
    %c0_40 = arith.constant 0 : index
    %c0_41 = arith.constant 0 : index
    %192 = vector.load %arg2[%191, %c0_40, %c0_41] : memref<8x8x128xf32, #tpu.memory_space<vmem>>, vector<1x8x128xf32>
    %193 = vector.shape_cast %192 : vector<1x8x128xf32> to vector<8x128xf32>
    %cst_42 = arith.constant dense<0.000000e+00> : vector<8x128xf32>
    %194 = tpu.matmul %169, %16, %cst_42 {dimension_numbers = #tpu.dot_dimension_numbers<[1], [0], [0], [1], [0, 0, 1, 1], [], []>} : vector<8x32xf32>, vector<32x128xf32>, vector<8x128xf32> -> vector<8x128xf32>
    %195 = arith.addf %193, %194 : vector<8x128xf32>
    %196 = vector.broadcast %11 : vector<1x128xf32> to vector<8x128xf32>
    %197 = arith.mulf %195, %196 : vector<8x128xf32>
    %198 = math.tanh %197 : vector<8x128xf32>
    %199 = vector.broadcast %11 : vector<1x128xf32> to vector<8x128xf32>
    %200 = arith.mulf %198, %199 : vector<8x128xf32>
    %201 = vector.broadcast %14 : vector<1x128xf32> to vector<8x128xf32>
    %202 = arith.addf %200, %201 : vector<8x128xf32>
    %203 = vector.extract_strided_slice %202 {offsets = [0, 0], sizes = [8, 32], strides = [1, 1]} : vector<8x128xf32> to vector<8x32xf32>
    %204 = vector.extract_strided_slice %202 {offsets = [0, 32], sizes = [8, 32], strides = [1, 1]} : vector<8x128xf32> to vector<8x32xf32>
    %205 = vector.extract_strided_slice %202 {offsets = [0, 64], sizes = [8, 32], strides = [1, 1]} : vector<8x128xf32> to vector<8x32xf32>
    %206 = vector.extract_strided_slice %202 {offsets = [0, 96], sizes = [8, 32], strides = [1, 1]} : vector<8x128xf32> to vector<8x32xf32>
    %207 = arith.mulf %204, %167 : vector<8x32xf32>
    %208 = arith.mulf %203, %205 : vector<8x32xf32>
    %209 = arith.addf %207, %208 : vector<8x32xf32>
    %210 = math.tanh %209 : vector<8x32xf32>
    %211 = arith.mulf %206, %210 : vector<8x32xf32>
    %cst_43 = arith.constant dense<0.000000e+00> : vector<8x128xf32>
    %212 = tpu.matmul %211, %17, %cst_43 {dimension_numbers = #tpu.dot_dimension_numbers<[1], [0], [0], [1], [0, 0, 1, 1], [], []>} : vector<8x32xf32>, vector<32x128xf32>, vector<8x128xf32> -> vector<8x128xf32>
    %cst_44 = arith.constant dense<0.000000e+00> : vector<8x128xf32>
    %213 = tpu.matmul %190, %18, %cst_44 {dimension_numbers = #tpu.dot_dimension_numbers<[1], [0], [0], [1], [0, 0, 1, 1], [], []>} : vector<8x32xf32>, vector<32x128xf32>, vector<8x128xf32> -> vector<8x128xf32>
    %214 = arith.addf %212, %213 : vector<8x128xf32>
    %215 = vector.broadcast %15 : vector<1x128xf32> to vector<8x128xf32>
    %216 = arith.addf %214, %215 : vector<8x128xf32>
    %217 = vector.broadcast %11 : vector<1x128xf32> to vector<8x128xf32>
    %218 = arith.mulf %216, %217 : vector<8x128xf32>
    %219 = math.tanh %218 : vector<8x128xf32>
    %220 = vector.broadcast %11 : vector<1x128xf32> to vector<8x128xf32>
    %221 = arith.mulf %219, %220 : vector<8x128xf32>
    %222 = vector.broadcast %14 : vector<1x128xf32> to vector<8x128xf32>
    %223 = arith.addf %221, %222 : vector<8x128xf32>
    %224 = vector.extract_strided_slice %223 {offsets = [0, 0], sizes = [8, 32], strides = [1, 1]} : vector<8x128xf32> to vector<8x32xf32>
    %225 = vector.extract_strided_slice %223 {offsets = [0, 32], sizes = [8, 32], strides = [1, 1]} : vector<8x128xf32> to vector<8x32xf32>
    %226 = vector.extract_strided_slice %223 {offsets = [0, 64], sizes = [8, 32], strides = [1, 1]} : vector<8x128xf32> to vector<8x32xf32>
    %227 = vector.extract_strided_slice %223 {offsets = [0, 96], sizes = [8, 32], strides = [1, 1]} : vector<8x128xf32> to vector<8x32xf32>
    %228 = arith.mulf %225, %188 : vector<8x32xf32>
    %229 = arith.mulf %224, %226 : vector<8x32xf32>
    %230 = arith.addf %228, %229 : vector<8x32xf32>
    %231 = math.tanh %230 : vector<8x32xf32>
    %232 = arith.mulf %227, %231 : vector<8x32xf32>
    %c5_i32 = arith.constant 5 : i32
    %233 = arith.index_cast %c5_i32 : i32 to index
    %c0_45 = arith.constant 0 : index
    %c0_46 = arith.constant 0 : index
    %234 = vector.load %arg2[%233, %c0_45, %c0_46] : memref<8x8x128xf32, #tpu.memory_space<vmem>>, vector<1x8x128xf32>
    %235 = vector.shape_cast %234 : vector<1x8x128xf32> to vector<8x128xf32>
    %cst_47 = arith.constant dense<0.000000e+00> : vector<8x128xf32>
    %236 = tpu.matmul %211, %16, %cst_47 {dimension_numbers = #tpu.dot_dimension_numbers<[1], [0], [0], [1], [0, 0, 1, 1], [], []>} : vector<8x32xf32>, vector<32x128xf32>, vector<8x128xf32> -> vector<8x128xf32>
    %237 = arith.addf %235, %236 : vector<8x128xf32>
    %238 = vector.broadcast %11 : vector<1x128xf32> to vector<8x128xf32>
    %239 = arith.mulf %237, %238 : vector<8x128xf32>
    %240 = math.tanh %239 : vector<8x128xf32>
    %241 = vector.broadcast %11 : vector<1x128xf32> to vector<8x128xf32>
    %242 = arith.mulf %240, %241 : vector<8x128xf32>
    %243 = vector.broadcast %14 : vector<1x128xf32> to vector<8x128xf32>
    %244 = arith.addf %242, %243 : vector<8x128xf32>
    %245 = vector.extract_strided_slice %244 {offsets = [0, 0], sizes = [8, 32], strides = [1, 1]} : vector<8x128xf32> to vector<8x32xf32>
    %246 = vector.extract_strided_slice %244 {offsets = [0, 32], sizes = [8, 32], strides = [1, 1]} : vector<8x128xf32> to vector<8x32xf32>
    %247 = vector.extract_strided_slice %244 {offsets = [0, 64], sizes = [8, 32], strides = [1, 1]} : vector<8x128xf32> to vector<8x32xf32>
    %248 = vector.extract_strided_slice %244 {offsets = [0, 96], sizes = [8, 32], strides = [1, 1]} : vector<8x128xf32> to vector<8x32xf32>
    %249 = arith.mulf %246, %209 : vector<8x32xf32>
    %250 = arith.mulf %245, %247 : vector<8x32xf32>
    %251 = arith.addf %249, %250 : vector<8x32xf32>
    %252 = math.tanh %251 : vector<8x32xf32>
    %253 = arith.mulf %248, %252 : vector<8x32xf32>
    %cst_48 = arith.constant dense<0.000000e+00> : vector<8x128xf32>
    %254 = tpu.matmul %253, %17, %cst_48 {dimension_numbers = #tpu.dot_dimension_numbers<[1], [0], [0], [1], [0, 0, 1, 1], [], []>} : vector<8x32xf32>, vector<32x128xf32>, vector<8x128xf32> -> vector<8x128xf32>
    %cst_49 = arith.constant dense<0.000000e+00> : vector<8x128xf32>
    %255 = tpu.matmul %232, %18, %cst_49 {dimension_numbers = #tpu.dot_dimension_numbers<[1], [0], [0], [1], [0, 0, 1, 1], [], []>} : vector<8x32xf32>, vector<32x128xf32>, vector<8x128xf32> -> vector<8x128xf32>
    %256 = arith.addf %254, %255 : vector<8x128xf32>
    %257 = vector.broadcast %15 : vector<1x128xf32> to vector<8x128xf32>
    %258 = arith.addf %256, %257 : vector<8x128xf32>
    %259 = vector.broadcast %11 : vector<1x128xf32> to vector<8x128xf32>
    %260 = arith.mulf %258, %259 : vector<8x128xf32>
    %261 = math.tanh %260 : vector<8x128xf32>
    %262 = vector.broadcast %11 : vector<1x128xf32> to vector<8x128xf32>
    %263 = arith.mulf %261, %262 : vector<8x128xf32>
    %264 = vector.broadcast %14 : vector<1x128xf32> to vector<8x128xf32>
    %265 = arith.addf %263, %264 : vector<8x128xf32>
    %266 = vector.extract_strided_slice %265 {offsets = [0, 0], sizes = [8, 32], strides = [1, 1]} : vector<8x128xf32> to vector<8x32xf32>
    %267 = vector.extract_strided_slice %265 {offsets = [0, 32], sizes = [8, 32], strides = [1, 1]} : vector<8x128xf32> to vector<8x32xf32>
    %268 = vector.extract_strided_slice %265 {offsets = [0, 64], sizes = [8, 32], strides = [1, 1]} : vector<8x128xf32> to vector<8x32xf32>
    %269 = vector.extract_strided_slice %265 {offsets = [0, 96], sizes = [8, 32], strides = [1, 1]} : vector<8x128xf32> to vector<8x32xf32>
    %270 = arith.mulf %267, %230 : vector<8x32xf32>
    %271 = arith.mulf %266, %268 : vector<8x32xf32>
    %272 = arith.addf %270, %271 : vector<8x32xf32>
    %273 = math.tanh %272 : vector<8x32xf32>
    %274 = arith.mulf %269, %273 : vector<8x32xf32>
    %c6_i32 = arith.constant 6 : i32
    %275 = arith.index_cast %c6_i32 : i32 to index
    %c0_50 = arith.constant 0 : index
    %c0_51 = arith.constant 0 : index
    %276 = vector.load %arg2[%275, %c0_50, %c0_51] : memref<8x8x128xf32, #tpu.memory_space<vmem>>, vector<1x8x128xf32>
    %277 = vector.shape_cast %276 : vector<1x8x128xf32> to vector<8x128xf32>
    %cst_52 = arith.constant dense<0.000000e+00> : vector<8x128xf32>
    %278 = tpu.matmul %253, %16, %cst_52 {dimension_numbers = #tpu.dot_dimension_numbers<[1], [0], [0], [1], [0, 0, 1, 1], [], []>} : vector<8x32xf32>, vector<32x128xf32>, vector<8x128xf32> -> vector<8x128xf32>
    %279 = arith.addf %277, %278 : vector<8x128xf32>
    %280 = vector.broadcast %11 : vector<1x128xf32> to vector<8x128xf32>
    %281 = arith.mulf %279, %280 : vector<8x128xf32>
    %282 = math.tanh %281 : vector<8x128xf32>
    %283 = vector.broadcast %11 : vector<1x128xf32> to vector<8x128xf32>
    %284 = arith.mulf %282, %283 : vector<8x128xf32>
    %285 = vector.broadcast %14 : vector<1x128xf32> to vector<8x128xf32>
    %286 = arith.addf %284, %285 : vector<8x128xf32>
    %287 = vector.extract_strided_slice %286 {offsets = [0, 0], sizes = [8, 32], strides = [1, 1]} : vector<8x128xf32> to vector<8x32xf32>
    %288 = vector.extract_strided_slice %286 {offsets = [0, 32], sizes = [8, 32], strides = [1, 1]} : vector<8x128xf32> to vector<8x32xf32>
    %289 = vector.extract_strided_slice %286 {offsets = [0, 64], sizes = [8, 32], strides = [1, 1]} : vector<8x128xf32> to vector<8x32xf32>
    %290 = vector.extract_strided_slice %286 {offsets = [0, 96], sizes = [8, 32], strides = [1, 1]} : vector<8x128xf32> to vector<8x32xf32>
    %291 = arith.mulf %288, %251 : vector<8x32xf32>
    %292 = arith.mulf %287, %289 : vector<8x32xf32>
    %293 = arith.addf %291, %292 : vector<8x32xf32>
    %294 = math.tanh %293 : vector<8x32xf32>
    %295 = arith.mulf %290, %294 : vector<8x32xf32>
    %cst_53 = arith.constant dense<0.000000e+00> : vector<8x128xf32>
    %296 = tpu.matmul %295, %17, %cst_53 {dimension_numbers = #tpu.dot_dimension_numbers<[1], [0], [0], [1], [0, 0, 1, 1], [], []>} : vector<8x32xf32>, vector<32x128xf32>, vector<8x128xf32> -> vector<8x128xf32>
    %cst_54 = arith.constant dense<0.000000e+00> : vector<8x128xf32>
    %297 = tpu.matmul %274, %18, %cst_54 {dimension_numbers = #tpu.dot_dimension_numbers<[1], [0], [0], [1], [0, 0, 1, 1], [], []>} : vector<8x32xf32>, vector<32x128xf32>, vector<8x128xf32> -> vector<8x128xf32>
    %298 = arith.addf %296, %297 : vector<8x128xf32>
    %299 = vector.broadcast %15 : vector<1x128xf32> to vector<8x128xf32>
    %300 = arith.addf %298, %299 : vector<8x128xf32>
    %301 = vector.broadcast %11 : vector<1x128xf32> to vector<8x128xf32>
    %302 = arith.mulf %300, %301 : vector<8x128xf32>
    %303 = math.tanh %302 : vector<8x128xf32>
    %304 = vector.broadcast %11 : vector<1x128xf32> to vector<8x128xf32>
    %305 = arith.mulf %303, %304 : vector<8x128xf32>
    %306 = vector.broadcast %14 : vector<1x128xf32> to vector<8x128xf32>
    %307 = arith.addf %305, %306 : vector<8x128xf32>
    %308 = vector.extract_strided_slice %307 {offsets = [0, 0], sizes = [8, 32], strides = [1, 1]} : vector<8x128xf32> to vector<8x32xf32>
    %309 = vector.extract_strided_slice %307 {offsets = [0, 32], sizes = [8, 32], strides = [1, 1]} : vector<8x128xf32> to vector<8x32xf32>
    %310 = vector.extract_strided_slice %307 {offsets = [0, 64], sizes = [8, 32], strides = [1, 1]} : vector<8x128xf32> to vector<8x32xf32>
    %311 = vector.extract_strided_slice %307 {offsets = [0, 96], sizes = [8, 32], strides = [1, 1]} : vector<8x128xf32> to vector<8x32xf32>
    %312 = arith.mulf %309, %272 : vector<8x32xf32>
    %313 = arith.mulf %308, %310 : vector<8x32xf32>
    %314 = arith.addf %312, %313 : vector<8x32xf32>
    %315 = math.tanh %314 : vector<8x32xf32>
    %316 = arith.mulf %311, %315 : vector<8x32xf32>
    %c7_i32 = arith.constant 7 : i32
    %317 = arith.index_cast %c7_i32 : i32 to index
    %c0_55 = arith.constant 0 : index
    %c0_56 = arith.constant 0 : index
    %318 = vector.load %arg2[%317, %c0_55, %c0_56] : memref<8x8x128xf32, #tpu.memory_space<vmem>>, vector<1x8x128xf32>
    %319 = vector.shape_cast %318 : vector<1x8x128xf32> to vector<8x128xf32>
    %cst_57 = arith.constant dense<0.000000e+00> : vector<8x128xf32>
    %320 = tpu.matmul %295, %16, %cst_57 {dimension_numbers = #tpu.dot_dimension_numbers<[1], [0], [0], [1], [0, 0, 1, 1], [], []>} : vector<8x32xf32>, vector<32x128xf32>, vector<8x128xf32> -> vector<8x128xf32>
    %321 = arith.addf %319, %320 : vector<8x128xf32>
    %322 = vector.broadcast %11 : vector<1x128xf32> to vector<8x128xf32>
    %323 = arith.mulf %321, %322 : vector<8x128xf32>
    %324 = math.tanh %323 : vector<8x128xf32>
    %325 = vector.broadcast %11 : vector<1x128xf32> to vector<8x128xf32>
    %326 = arith.mulf %324, %325 : vector<8x128xf32>
    %327 = vector.broadcast %14 : vector<1x128xf32> to vector<8x128xf32>
    %328 = arith.addf %326, %327 : vector<8x128xf32>
    %329 = vector.extract_strided_slice %328 {offsets = [0, 0], sizes = [8, 32], strides = [1, 1]} : vector<8x128xf32> to vector<8x32xf32>
    %330 = vector.extract_strided_slice %328 {offsets = [0, 32], sizes = [8, 32], strides = [1, 1]} : vector<8x128xf32> to vector<8x32xf32>
    %331 = vector.extract_strided_slice %328 {offsets = [0, 64], sizes = [8, 32], strides = [1, 1]} : vector<8x128xf32> to vector<8x32xf32>
    %332 = vector.extract_strided_slice %328 {offsets = [0, 96], sizes = [8, 32], strides = [1, 1]} : vector<8x128xf32> to vector<8x32xf32>
    %333 = arith.mulf %330, %293 : vector<8x32xf32>
    %334 = arith.mulf %329, %331 : vector<8x32xf32>
    %335 = arith.addf %333, %334 : vector<8x32xf32>
    %336 = math.tanh %335 : vector<8x32xf32>
    %337 = arith.mulf %332, %336 : vector<8x32xf32>
    %cst_58 = arith.constant dense<0.000000e+00> : vector<8x128xf32>
    %338 = tpu.matmul %337, %17, %cst_58 {dimension_numbers = #tpu.dot_dimension_numbers<[1], [0], [0], [1], [0, 0, 1, 1], [], []>} : vector<8x32xf32>, vector<32x128xf32>, vector<8x128xf32> -> vector<8x128xf32>
    %cst_59 = arith.constant dense<0.000000e+00> : vector<8x128xf32>
    %339 = tpu.matmul %316, %18, %cst_59 {dimension_numbers = #tpu.dot_dimension_numbers<[1], [0], [0], [1], [0, 0, 1, 1], [], []>} : vector<8x32xf32>, vector<32x128xf32>, vector<8x128xf32> -> vector<8x128xf32>
    %340 = arith.addf %338, %339 : vector<8x128xf32>
    %341 = vector.broadcast %15 : vector<1x128xf32> to vector<8x128xf32>
    %342 = arith.addf %340, %341 : vector<8x128xf32>
    %343 = vector.broadcast %11 : vector<1x128xf32> to vector<8x128xf32>
    %344 = arith.mulf %342, %343 : vector<8x128xf32>
    %345 = math.tanh %344 : vector<8x128xf32>
    %346 = vector.broadcast %11 : vector<1x128xf32> to vector<8x128xf32>
    %347 = arith.mulf %345, %346 : vector<8x128xf32>
    %348 = vector.broadcast %14 : vector<1x128xf32> to vector<8x128xf32>
    %349 = arith.addf %347, %348 : vector<8x128xf32>
    %350 = vector.extract_strided_slice %349 {offsets = [0, 0], sizes = [8, 32], strides = [1, 1]} : vector<8x128xf32> to vector<8x32xf32>
    %351 = vector.extract_strided_slice %349 {offsets = [0, 32], sizes = [8, 32], strides = [1, 1]} : vector<8x128xf32> to vector<8x32xf32>
    %352 = vector.extract_strided_slice %349 {offsets = [0, 64], sizes = [8, 32], strides = [1, 1]} : vector<8x128xf32> to vector<8x32xf32>
    %353 = vector.extract_strided_slice %349 {offsets = [0, 96], sizes = [8, 32], strides = [1, 1]} : vector<8x128xf32> to vector<8x32xf32>
    %354 = arith.mulf %351, %314 : vector<8x32xf32>
    %355 = arith.mulf %350, %352 : vector<8x32xf32>
    %356 = arith.addf %354, %355 : vector<8x32xf32>
    %357 = math.tanh %356 : vector<8x32xf32>
    %358 = arith.mulf %353, %357 : vector<8x32xf32>
    %c8_i32 = arith.constant 8 : i32
    %c0_60 = arith.constant 0 : index
    %c0_61 = arith.constant 0 : index
    %359 = vector.load %arg10[%c0_60, %c0_61] : memref<8x32xf32, #tpu.memory_space<vmem>>, vector<8x32xf32>
    tpu.vector_store %arg10[%c0_60, %c0_61], %337 {strides = array<i32>} : memref<8x32xf32, #tpu.memory_space<vmem>>, vector<8x32xf32>,
    %c0_62 = arith.constant 0 : index
    %c0_63 = arith.constant 0 : index
    %360 = vector.load %arg12[%c0_62, %c0_63] : memref<8x32xf32, #tpu.memory_space<vmem>>, vector<8x32xf32>
    tpu.vector_store %arg12[%c0_62, %c0_63], %335 {strides = array<i32>} : memref<8x32xf32, #tpu.memory_space<vmem>>, vector<8x32xf32>,
    %c0_64 = arith.constant 0 : index
    %c0_65 = arith.constant 0 : index
    %361 = vector.load %arg11[%c0_64, %c0_65] : memref<8x32xf32, #tpu.memory_space<vmem>>, vector<8x32xf32>
    tpu.vector_store %arg11[%c0_64, %c0_65], %358 {strides = array<i32>} : memref<8x32xf32, #tpu.memory_space<vmem>>, vector<8x32xf32>,
    %c0_66 = arith.constant 0 : index
    %c0_67 = arith.constant 0 : index
    %362 = vector.load %arg13[%c0_66, %c0_67] : memref<8x32xf32, #tpu.memory_space<vmem>>, vector<8x32xf32>
    tpu.vector_store %arg13[%c0_66, %c0_67], %356 {strides = array<i32>} : memref<8x32xf32, #tpu.memory_space<vmem>>, vector<8x32xf32>,
    %c0_i32_68 = arith.constant 0 : i32
    %363 = arith.cmpi eq, %arg1, %c0_i32_68 : i32
    %364 = arith.extui %363 : i1 to i32
    %c0_i32_69 = arith.constant 0 : i32
    %365 = arith.cmpi ne, %364, %c0_i32_69 : i32
    scf.if %365 {
      %c0_70 = arith.constant 0 : index
      %c0_71 = arith.constant 0 : index
      %366 = vector.load %arg7[%c0_70, %c0_71] : memref<32x128xf32, #tpu.memory_space<vmem>>, vector<32x128xf32>
      %cst_72 = arith.constant dense<0.000000e+00> : vector<8x128xf32>
      %367 = tpu.matmul %358, %366, %cst_72 {dimension_numbers = #tpu.dot_dimension_numbers<[1], [0], [0], [1], [0, 0, 1, 1], [], []>} : vector<8x32xf32>, vector<32x128xf32>, vector<8x128xf32> -> vector<8x128xf32>
      %c0_73 = arith.constant 0 : index
      %c0_74 = arith.constant 0 : index
      %368 = vector.load %arg8[%c0_73, %c0_74] : memref<1x128xf32, #tpu.memory_space<vmem>>, vector<1x128xf32>
      %369 = vector.broadcast %368 : vector<1x128xf32> to vector<8x128xf32>
      %370 = arith.addf %367, %369 : vector<8x128xf32>
      %c0_75 = arith.constant 0 : index
      %c0_76 = arith.constant 0 : index
      %371 = vector.load %arg9[%c0_75, %c0_76] : memref<8x128xf32, #tpu.memory_space<vmem>>, vector<8x128xf32>
      tpu.vector_store %arg9[%c0_75, %c0_76], %370 {strides = array<i32>} : memref<8x128xf32, #tpu.memory_space<vmem>>, vector<8x128xf32>,
    } else {
    }
    return
  }
  func.func @transform_0(%arg0: i32, %arg1: i32) -> (i32, i32, i32) {
    %c0_i32 = arith.constant 0 : i32
    %c0_i32_0 = arith.constant 0 : i32
    return %arg1, %arg0, %c0_i32 : i32, i32, i32
  }
  func.func @transform_1(%arg0: i32, %arg1: i32) -> (i32, i32) {
    %c0_i32 = arith.constant 0 : i32
    %c0_i32_0 = arith.constant 0 : i32
    %c0_i32_1 = arith.constant 0 : i32
    return %c0_i32, %c0_i32_0 : i32, i32
  }
  func.func @transform_2(%arg0: i32, %arg1: i32) -> (i32, i32) {
    %c0_i32 = arith.constant 0 : i32
    %c0_i32_0 = arith.constant 0 : i32
    %c0_i32_1 = arith.constant 0 : i32
    return %c0_i32, %c0_i32_0 : i32, i32
  }
  func.func @transform_3(%arg0: i32, %arg1: i32) -> (i32, i32) {
    %c0_i32 = arith.constant 0 : i32
    %c0_i32_0 = arith.constant 0 : i32
    %c0_i32_1 = arith.constant 0 : i32
    return %c0_i32, %c0_i32_0 : i32, i32
  }
  func.func @transform_4(%arg0: i32, %arg1: i32) -> (i32, i32) {
    %c0_i32 = arith.constant 0 : i32
    %c0_i32_0 = arith.constant 0 : i32
    %c0_i32_1 = arith.constant 0 : i32
    return %c0_i32, %c0_i32_0 : i32, i32
  }
  func.func @transform_5(%arg0: i32, %arg1: i32) -> (i32, i32) {
    %c0_i32 = arith.constant 0 : i32
    %c0_i32_0 = arith.constant 0 : i32
    %c0_i32_1 = arith.constant 0 : i32
    return %c0_i32, %c0_i32_0 : i32, i32
  }
  func.func @transform_6(%arg0: i32, %arg1: i32) -> (i32, i32) {
    %c0_i32 = arith.constant 0 : i32
    %c0_i32_0 = arith.constant 0 : i32
    %c0_i32_1 = arith.constant 0 : i32
    return %c0_i32, %c0_i32_0 : i32, i32
  }
  func.func @transform_7(%arg0: i32, %arg1: i32) -> (i32, i32) {
    %c0_i32 = arith.constant 0 : i32
    %c0_i32_0 = arith.constant 0 : i32
    return %arg0, %c0_i32 : i32, i32
  }
}

</mosaic_0001>

<bundles_post_ra>
// kernel: tpu_custom_call.1
= control target key start
LH: loop header
LB: loop body
LE: loop exit
PB: predicated region body
PF: predicated region fallthrough
CT: control target
= control target key end

     0   :  { %12 = vsyncpa [#allocation7], 0  ;;  %s3703_s0 = inlined_call_operand.hbm [shape: f32[8,8,128], index: 0, kind: input, shape index: {}]   ;;  %s3704_s1 = inlined_call_operand.hbm [shape: f32[32,128], index: 1, kind: input, shape index: {}]   ;;  %s3705_s2 = inlined_call_operand.hbm [shape: f32[32,128], index: 2, kind: input, shape index: {}]   ;;  %s3706_s3 = inlined_call_operand.hbm [shape: f32[32,128], index: 3, kind: input, shape index: {}]   ;;  %s3707_s4 = inlined_call_operand.vmem [shape: f32[1,128], index: 4, kind: input, shape index: {}]   ;;  %s3708_s5 = inlined_call_operand.hbm [shape: f32[32,128], index: 5, kind: input, shape index: {}]   ;;  %s3709_s6 = inlined_call_operand.vmem [shape: f32[1,128], index: 6, kind: input, shape index: {}]   ;;  %s3710_s7 = inlined_call_operand.hbm [shape: f32[8,128], index: 7, kind: output, shape index: {}]  }
   0x1   :  { %13 = vsyncpa [#allocation10], 0 }
   0x2   :  { %14 = vsyncpa [#allocation13], 0 }
   0x3   :  { %15 = vsyncpa [#allocation8], 0  ;;  %s3188_s24 = smov [#allocation9]   ;;  %s3189_s26 = smov [#allocation12]  }
   0x4   :  { %s33_s25 = sshll.u32 %s3188_s24, 4  ;;  %s57_s27 = sshll.u32 %s3189_s26, 4  ;;  %s34_s25 = int_to_ptr.vmem [resolvable:$true] %s33_s25  ;;  %s3243_s27 = int_to_ptr.vmem [resolvable:$true] %s57_s27 }
   0x5   :  { %s3048_s30 = scalar_lea.hbm %s3704_s1, 512 }
   0x6   :  { %p3049_p0 = scmp.ne.s32.totalorder %s3704_s1, %s3048_s30  ;;  %p3052_p1 = scmp.lt.u32.totalorder %s3048_s30, %s3704_s1 }
   0x8   :  { %p3054_p2 = pnand %p3052_p1, %p3049_p0 }
   0xa   :  { %3057 = shalt.err (!%p3054_p2)
}
   0xb   :  { %s3058_s12 = scalar_lea.vmem %s34_s25, 512  ;;  %p3063_p4 = scmp.lt.s32.totalorder %s34_s25, %s34_s25 }
   0xc   :  { %p3059_p3 = scmp.ne.s32.totalorder %s34_s25, %s3058_s12  ;;  %p3064_p5 = scmp.lt.s32.totalorder %s3058_s12, %s3058_s12 }
   0xe   :  { %p3065_p6 = por %p3064_p5, %p3063_p4 }
  0x10   :  { %p3066_p7 = pnand %p3065_p6, %p3059_p3 }
  0x12   :  { %3069 = shalt.err (!%p3066_p7)
}
  0x13   :  { %s3190_s13 = smov 128   ;;  %s3191_s14 = smov 8  }
  0x14   :  { %39 = dma.hbm_to_vmem [thread:$0]  %s3704_s1, 512, %s34_s25, [#allocation10], %s3190_s13, %s3190_s13, %s3191_s14  }
  0x15   :  { %s3070_s19 = scalar_lea.hbm %s3706_s3, 512 }
  0x16   :  { %p3071_p8 = scmp.ne.s32.totalorder %s3706_s3, %s3070_s19  ;;  %p3074_p9 = scmp.lt.u32.totalorder %s3070_s19, %s3706_s3 }
  0x18   :  { %p3076_p10 = pnand %p3074_p9, %p3071_p8 }
  0x1a   :  { %3079 = shalt.err (!%p3076_p10)
}
  0x1b   :  { %s3080_s24 = scalar_lea.vmem %s3243_s27, 512  ;;  %p3085_p12 = scmp.lt.s32.totalorder %s3243_s27, %s3243_s27 }
  0x1c   :  { %p3081_p11 = scmp.ne.s32.totalorder %s3243_s27, %s3080_s24  ;;  %p3086_p13 = scmp.lt.s32.totalorder %s3080_s24, %s3080_s24 }
  0x1e   :  { %p3087_p0 = por %p3086_p13, %p3085_p12 }
  0x20   :  { %p3088_p1 = pnand %p3087_p0, %p3081_p11 }
  0x22   :  { %3091 = shalt.err (!%p3088_p1)
}
  0x23   :  { %63 = dma.hbm_to_vmem [thread:$0]  %s3706_s3, 512, %s3243_s27, [#allocation13], %s3190_s13, %s3190_s13, %s3191_s14  }
  0x24   :  { %s3192_s26 = smov [#allocation6]   ;;  %s3193_s29 = smov [#allocation11]  }
  0x25   :  { %s21_s28 = sshll.u32 %s3192_s26, 4  ;;  %s45_s30 = sshll.u32 %s3193_s29, 4  ;;  %s22_s28 = int_to_ptr.vmem [resolvable:$true] %s21_s28  ;;  %s3280_s30 = int_to_ptr.vmem [resolvable:$true] %s45_s30 }
  0x26   :  { %s3092_s10 = scalar_lea.hbm %s3703_s0, 1024 }
  0x27   :  { %p3093_p2 = scmp.ne.s32.totalorder %s3703_s0, %s3092_s10  ;;  %p3096_p3 = scmp.lt.u32.totalorder %s3092_s10, %s3703_s0 }
  0x29   :  { %p3098_p4 = pnand %p3096_p3, %p3093_p2 }
  0x2b   :  { %3101 = shalt.err (!%p3098_p4)
}
  0x2c   :  { %s3102_s3 = scalar_lea.vmem %s22_s28, 1024  ;;  %p3107_p6 = scmp.lt.s32.totalorder %s22_s28, %s22_s28 }
  0x2d   :  { %p3103_p5 = scmp.ne.s32.totalorder %s22_s28, %s3102_s3  ;;  %p3108_p7 = scmp.lt.s32.totalorder %s3102_s3, %s3102_s3 }
  0x2f   :  { %p3109_p8 = por %p3108_p7, %p3107_p6 }
  0x31   :  { %p3110_p9 = pnand %p3109_p8, %p3103_p5 }
  0x33   :  { %3113 = shalt.err (!%p3110_p9)
}
  0x34   :  { %27 = dma.hbm_to_vmem [thread:$0]  %s3703_s0, 1024, %s22_s28, [#allocation7], %s3190_s13, %s3190_s13, %s3191_s14  }
  0x35   :  { %s3114_s20 = scalar_lea.hbm %s3705_s2, 512 }
  0x36   :  { %p3115_p10 = scmp.ne.s32.totalorder %s3705_s2, %s3114_s20  ;;  %p3118_p11 = scmp.lt.u32.totalorder %s3114_s20, %s3705_s2 }
  0x38   :  { %p3120_p12 = pnand %p3118_p11, %p3115_p10 }
  0x3a   :  { %3123 = shalt.err (!%p3120_p12)
}
  0x3b   :  { %s3124_s1 = scalar_lea.vmem %s3280_s30, 512  ;;  %p3129_p0 = scmp.lt.s32.totalorder %s3280_s30, %s3280_s30 }
  0x3c   :  { %p3125_p13 = scmp.ne.s32.totalorder %s3280_s30, %s3124_s1  ;;  %p3130_p1 = scmp.lt.s32.totalorder %s3124_s1, %s3124_s1 }
  0x3e   :  { %p3131_p2 = por %p3130_p1, %p3129_p0 }
  0x40   :  { %p3132_p3 = pnand %p3131_p2, %p3125_p13 }
  0x42   :  { %3135 = shalt.err (!%p3132_p3)
}
  0x43   :  { %51 = dma.hbm_to_vmem [thread:$0]  %s3705_s2, 512, %s3280_s30, [#allocation10], %s3190_s13, %s3190_s13, %s3191_s14  }
  0x44   :  { %s3194_s26 = smov [#allocation14]   ;;  %s3136_s9 = scalar_lea.hbm %s3708_s5, 512 }
  0x45   :  { %s71_s28 = sshll.u32 %s3194_s26, 4  ;;  %p3137_p4 = scmp.ne.s32.totalorder %s3708_s5, %s3136_s9  ;;  %s72_s28 = int_to_ptr.vmem [resolvable:$true] %s71_s28 }
  0x46   :  { %p3140_p5 = scmp.lt.u32.totalorder %s3136_s9, %s3708_s5 }
  0x48   :  { %p3142_p6 = pnand %p3140_p5, %p3137_p4 }
  0x4a   :  { %3145 = shalt.err (!%p3142_p6)
}
  0x4b   :  { %s3146_s16 = scalar_lea.vmem %s72_s28, 512  ;;  %p3151_p8 = scmp.lt.s32.totalorder %s72_s28, %s72_s28 }
  0x4c   :  { %p3147_p7 = scmp.ne.s32.totalorder %s72_s28, %s3146_s16  ;;  %p3152_p9 = scmp.lt.s32.totalorder %s3146_s16, %s3146_s16 }
  0x4e   :  { %p3153_p10 = por %p3152_p9, %p3151_p8 }
  0x50   :  { %p3154_p11 = pnand %p3153_p10, %p3147_p7 }
  0x52   :  { %3157 = shalt.err (!%p3154_p11)
}
  0x53   :  { %77 = dma.hbm_to_vmem [thread:$0]  %s3708_s5, 512, %s72_s28, [#allocation13], %s3190_s13, %s3190_s13, %s3191_s14  }
  0x54   :  { %3180 = dma.done.wait [#allocation7], 1024  }
  0x55   :  { %3181 = vsyncadd [#allocation7], 4294966272 }
  0x56   :  { %3182 = dma.done.wait [#allocation10], 1024  }
  0x57   :  { %3183 = vsyncadd [#allocation10], 4294966272 }
  0x58   :  { %3184 = dma.done.wait [#allocation13], 1024  }
  0x59   :  { %3185 = vsyncadd [#allocation13], 4294966272  ;;  %vm99_vm0 = vcmask 261120   ;;  %v3195_v0 = vmov 0.0|0.0   ;;  %vm3196_vm1 = vmmov 0   ;;  %v3197_v1 = vmov 0.0  }
  0x5a   :  { %2819 = vmatprep.subr.bf16.mxu0 %v3195_v0  ;;  %2552 = vmatprep.mubr.msk.f32.mxu0 %vm3196_vm1, %v3197_v1  ;;  %100 = vst.msk [vmem:[#allocation2] sm:$0xff] %vm99_vm0, %v3197_v1  ;;  %101 = vst.msk [vmem:[#allocation4] sm:$0xff] %vm99_vm0, %v3197_v1  ;;  %v112_v2 = vld [vmem:[#allocation9] sm:$0xff]  ;;  %v113_v3 = vld [vmem:[#allocation9 + $0x8] sm:$0xff]  ;;  %v104_v9 = vlaneseq  ;;  %v3198_v12 = vmov 0.5   ;;  %s3199_s5 = smov 64  }
  0x5b   :  { %102 = vst.msk [vmem:[#allocation3] sm:$0xff] %vm99_vm0, %v3197_v1  ;;  %103 = vst.msk [vmem:[#allocation5] sm:$0xff] %vm99_vm0, %v3197_v1  ;;  %2825 = vmatprep.subr.bf16.mxu1 %v3195_v0  ;;  %2563 = vmatprep.mubr.msk.f32.mxu1 %vm3196_vm1, %v3197_v1  ;;  %v114_v4 = vld [vmem:[#allocation9 + $0x10] sm:$0xff]  ;;  %v3346_v5 = vpack.c.bf16 %v113_v3, %v112_v2  ;;  %v115_v6 = vld [vmem:[#allocation9 + $0x18] sm:$0xff]  ;;  %s3200_s13 = smov 32   ;;  %s3202_s18 = smov [#allocation15]  }
  0x5c   :  { %v3349_v7 = vpack.c.bf16 %v115_v6, %v114_v4  ;;  %v105_v10 = vand.u32 127, %v104_v9  ;;  %v128_v11 = vld [vmem:[#allocation6] sm:$0xff]  ;;  %v121_v30 = vld [vmem:[#allocation12 + $0x8] sm:$0xff]  ;;  %v122_v31 = vld [vmem:[#allocation12 + $0x10] sm:$0xff]  ;;  %s2381_s19 = sshll.u32 %s3202_s18, 4  ;;  %s2382_s19 = int_to_ptr.vmem [resolvable:$true] %s2381_s19 }
  0x5d   :  { %2821 = vmatpush3.bf16.msra.mxu0 %v3346_v5  ;;  %v120_v29 = vld [vmem:[#allocation12] sm:$0xff]  ;;  %v123_v33 = vld [vmem:[#allocation12 + $0x18] sm:$0xff]  ;;  %v117_v35 = vld [vmem:[#allocation11 + $0x8] sm:$0xff]  ;;  %s3158_s20 = scalar_lea.vmem %s2382_s19, 128  ;;  %p3163_p13 = scmp.lt.s32.totalorder %s2382_s19, %s2382_s19 }
  0x5e   :  { %2822 = vmatprep.subr.bf16.mxu0 %v3195_v0  ;;  %vm106_vm2 = vcmp.ge.s32.totalorder %v105_v10, 64  ;;  %vm107_vm3 = vcmp.lt.s32.totalorder %v105_v10, 96  ;;  %v3370_v32 = vpack.c.bf16 %v121_v30, %v120_v29  ;;  %v116_v34 = vld [vmem:[#allocation11] sm:$0xff]  ;;  %v118_v36 = vld [vmem:[#allocation11 + $0x10] sm:$0xff]  ;;  %v119_v37 = vld [vmem:[#allocation11 + $0x18] sm:$0xff]  ;;  %v3373_v38 = vpack.c.bf16 %v123_v33, %v122_v31  ;;  %p3159_p12 = scmp.ne.s32.totalorder %s2382_s19, %s3158_s20  ;;  %p3164_p0 = scmp.lt.s32.totalorder %s3158_s20, %s3158_s20 }
  0x5f   :  { %vm108_vm4 = vmand %vm106_vm2, %vm107_vm3  ;;  %v3375_v39 = vpack.c.bf16 %v117_v35, %v116_v34  ;;  %v3379_v40 = vpack.c.bf16 %v119_v37, %v118_v36  ;;  %v410_v48 = vld [vmem:[#allocation6 + $0x8] sm:$0xff]  ;;  %v3412_v49 = vld [vmem:[%s3707_s4] ss:$0 sm:$0xff]  ;;  %s3201_s4 = smov 96  }
  0x60   :  { %v3357_v13 = vsel %vm108_vm4, 1.0, %v3198_v12  ;;  %v3360_v19 = vsel %vm108_vm4, 0.0, %v3198_v12  ;;  %2827 = vmatpush3.bf16.msra.mxu1 %v3370_v32  ;;  %v676_v35 = vld [vmem:[#allocation6 + $0x10] sm:$0xff]  ;;  %p3165_p1 = por %p3164_p0, %p3163_p13 }
  0x61   :  { %2824 = vmatpush3.bf16.msra.mxu0 %v3349_v7  ;;  %v124_v8 = vld [vmem:[#allocation2] sm:$0xff]  ;;  %v126_v22 = vld [vmem:[#allocation4] sm:$0xff]  ;;  %2828 = vmatprep.subr.bf16.mxu1 %v3195_v0 }
  0x62   :  { %2831 = vmatprep.subr.bf16.mxu0 %v3195_v0  ;;  %v125_v41 = vld [vmem:[#allocation3] sm:$0xff]  ;;  %v127_v3 = vld [vmem:[#allocation5] sm:$0xff]  ;;  %p3166_p2 = pnand %p3165_p1, %p3159_p12 }
  0x64   :  { %2553 = vmatmul.mubr.msk.f32.vlgmr.msra.gmra.mrb[0].mxu0 %vm99_vm0, %v124_v8  ;;  %2830 = vmatpush3.bf16.msra.mxu1 %v3373_v38 }
  0x65   :  { %2574 = vmatprep.mubr.msk.f32.mxu0 %vm3196_vm1, %v3197_v1  ;;  %2833 = vmatpush3.bf16.msra.mxu0 %v3375_v39 }
  0x66   :  { %2834 = vmatprep.subr.bf16.mxu0 %v3195_v0  ;;  %2837 = vmatprep.subr.bf16.mxu1 %v3195_v0 }
  0x67   :  { %2564 = vmatmul.mubr.msk.f32.vlgmr.msra.gmra.mrb[0].mxu1 %vm99_vm0, %v125_v41 }
  0x68   :  { %2839 = vmatpush3.bf16.msra.mxu1 %v3346_v5  ;;  %2585 = vmatprep.mubr.msk.f32.mxu1 %vm3196_vm1, %v3197_v1 }
  0x69   :  { %2836 = vmatpush3.bf16.msra.mxu0 %v3379_v40  ;;  %2840 = vmatprep.subr.bf16.mxu1 %v3195_v0 }
  0x6a   :  { %2843 = vmatprep.subr.bf16.mxu0 %v3195_v0 }
  0x6c   :  { %2842 = vmatpush3.bf16.msra.mxu1 %v3349_v7 }
  0x6d   :  { %2849 = vmatprep.subr.bf16.mxu1 %v3195_v0 }
 0x137   :  { %v199_v14 = vpop.f32.mrb[0].mxu0 }
 0x138   :  { %v203_v15 = vadd.f32 %v199_v14, %v128_v11  ;;  %v2554_v16 = vpop.f32.mrb[1].mxu0 }
 0x13a   :  { %v204_v17 = vmul.f32 %v203_v15, %v3357_v13  ;;  %v298_v45 = vpop.f32.mrb[0].mxu1 }
 0x13b   :  { %v2565_v46 = vpop.f32.mrb[1].mxu1 }
 0x13c   :  { %2984 = vtanh.f32 %v204_v17 }
 0x146   :  { %v2985_v18 = vpop.eup %2984 }
 0x147   :  { %v206_v20 = vmul.f32 %v2985_v18, %v3357_v13 }
 0x149   :  { %v207_v21 = vadd.f32 %v206_v20, %v3360_v19 }
 0x14b   :  { %214 = vrot.lane.b32.xlu0 %v207_v21, %s3199_s5 }
 0x14f   :  { %209 = vrot.lane.b32.xlu0 %v126_v22, %s3200_s13 }
 0x1bd   :  { %v215_v23 = vpop.permute.xlu0 %214 }
 0x1be   :  { %v217_v24 = vmul.f32 %v215_v23, %v207_v21 }
 0x1c0   :  { %219 = vrot.lane.b32.xlu1 %v217_v24, %s3200_s13 }
 0x1c1   :  { %v210_v25 = vpop.permute.xlu0 %209 }
 0x1c2   :  { %v212_v26 = vmul.f32 %v210_v25, %v207_v21 }
 0x232   :  { %v220_v27 = vpop.permute.xlu1 %219 }
 0x233   :  { %v3367_v28 = vadd.f32 %v220_v27, %v212_v26 }
 0x235   :  { %2986 = vtanh.f32 %v3367_v28 }
 0x23f   :  { %v2987_v42 = vpop.eup %2986 }
 0x240   :  { %225 = vrot.lane.b32.xlu1 %v2987_v42, %s3199_s5 }
 0x2b2   :  { %v226_v43 = vpop.permute.xlu1 %225 }
 0x2b3   :  { %v228_v44 = vmul.f32 %v226_v43, %v207_v21 }
 0x2b5   :  { %303 = vrot.lane.b32.xlu0 %v228_v44, %s3200_s13 }
 0x327   :  { %v304_v47 = vpop.permute.xlu0 %303 }
 0x328   :  { %2575 = vmatmul.mubr.msk.f32.vlgmr.msra.gmra.mrb[2].mxu0 %vm99_vm0, %v304_v47  ;;  %2586 = vmatmul.mubr.msk.f32.vlgmr.msra.gmra.mrb[2].mxu1 %vm99_vm0, %v304_v47 }
 0x329   :  { %2851 = vmatpush3.bf16.msra.mxu1 %v3375_v39  ;;  %2845 = vmatpush3.bf16.msra.mxu0 %v3370_v32 }
 0x32a   :  { %2852 = vmatprep.subr.bf16.mxu1 %v3195_v0  ;;  %2846 = vmatprep.subr.bf16.mxu0 %v3195_v0 }
 0x32b   :  { %2607 = vmatprep.mubr.msk.f32.mxu1 %vm3196_vm1, %v3197_v1  ;;  %2596 = vmatprep.mubr.msk.f32.mxu0 %vm3196_vm1, %v3197_v1 }
 0x32d   :  { %2854 = vmatpush3.bf16.msra.mxu1 %v3379_v40  ;;  %2848 = vmatpush3.bf16.msra.mxu0 %v3373_v38 }
 0x32e   :  { %2855 = vmatprep.subr.bf16.mxu0 %v3195_v0  ;;  %2861 = vmatprep.subr.bf16.mxu1 %v3195_v0 }
 0x3fb   :  { %v373_v50 = vpop.f32.mrb[2].mxu0  ;;  %v477_v51 = vpop.f32.mrb[2].mxu1 }
 0x3fc   :  { %v374_v52 = vadd.f32 %v373_v50, %v298_v45  ;;  %v481_v53 = vadd.f32 %v477_v51, %v410_v48  ;;  %v2576_v54 = vpop.f32.mrb[3].mxu0  ;;  %v2587_v55 = vpop.f32.mrb[3].mxu1 }
 0x3fe   :  { %v383_v56 = vadd.f32 %v3412_v49, %v374_v52  ;;  %v482_v57 = vmul.f32 %v481_v53, %v3357_v13 }
 0x400   :  { %v384_v58 = vmul.f32 %v383_v56, %v3357_v13  ;;  %2988 = vtanh.f32 %v482_v57 }
 0x402   :  { %2990 = vtanh.f32 %v384_v58 }
 0x40a   :  { %v2989_v59 = vpop.eup %2988 }
 0x40b   :  { %v484_v60 = vmul.f32 %v2989_v59, %v3357_v13 }
 0x40c   :  { %v2991_v61 = vpop.eup %2990 }
 0x40d   :  { %v485_v62 = vadd.f32 %v484_v60, %v3360_v19  ;;  %v386_v63 = vmul.f32 %v2991_v61, %v3357_v13 }
 0x40f   :  { %488 = vrot.lane.b32.xlu0 %v485_v62, %s3199_s5  ;;  %v387_v2 = vadd.f32 %v386_v63, %v3360_v19  ;;  %v486_v11 = vmul.f32 %v485_v62, %v3367_v28 }
 0x411   :  { %394 = vrot.lane.b32.xlu1 %v387_v2, %s3199_s5 }
 0x415   :  { %389 = vrot.lane.b32.xlu1 %v127_v3, %s3200_s13 }
 0x481   :  { %v489_v4 = vpop.permute.xlu0 %488 }
 0x482   :  { %v491_v6 = vmul.f32 %v489_v4, %v485_v62 }
 0x483   :  { %v395_v8 = vpop.permute.xlu1 %394 }
 0x484   :  { %v397_v9 = vmul.f32 %v395_v8, %v387_v2  ;;  %493 = vrot.lane.b32.xlu1 %v491_v6, %s3200_s13 }
 0x486   :  { %399 = vrot.lane.b32.xlu0 %v397_v9, %s3200_s13 }
 0x487   :  { %v390_v10 = vpop.permute.xlu1 %389 }
 0x488   :  { %v392_v14 = vmul.f32 %v390_v10, %v387_v2 }
 0x4f6   :  { %v494_v12 = vpop.permute.xlu1 %493 }
 0x4f7   :  { %v3427_v15 = vadd.f32 %v494_v12, %v486_v11  ;;  %v942_v11 = vld [vmem:[#allocation6 + $0x18] sm:$0xff] }
 0x4f8   :  { %v400_v16 = vpop.permute.xlu0 %399 }
 0x4f9   :  { %2992 = vtanh.f32 %v3427_v15  ;;  %v402_v17 = vadd.f32 %v400_v16, %v392_v14 }
 0x4fb   :  { %2994 = vtanh.f32 %v402_v17 }
 0x503   :  { %v2993_v18 = vpop.eup %2992 }
 0x504   :  { %499 = vrot.lane.b32.xlu1 %v2993_v18, %s3199_s5 }
 0x505   :  { %v2995_v20 = vpop.eup %2994 }
 0x506   :  { %405 = vrot.lane.b32.xlu0 %v2995_v20, %s3199_s5 }
 0x576   :  { %v500_v21 = vpop.permute.xlu1 %499 }
 0x577   :  { %v502_v22 = vmul.f32 %v500_v21, %v485_v62 }
 0x578   :  { %v406_v23 = vpop.permute.xlu0 %405 }
 0x579   :  { %v408_v24 = vmul.f32 %v406_v23, %v387_v2  ;;  %579 = vrot.lane.b32.xlu1 %v502_v22, %s3200_s13 }
 0x57b   :  { %504 = vrot.lane.b32.xlu0 %v408_v24, %s3200_s13 }
 0x5eb   :  { %v580_v25 = vpop.permute.xlu1 %579 }
 0x5ec   :  { %2608 = vmatmul.mubr.msk.f32.vlgmr.msra.gmra.mrb[4].mxu1 %vm99_vm0, %v580_v25 }
 0x5ed   :  { %v505_v26 = vpop.permute.xlu0 %504  ;;  %2863 = vmatpush3.bf16.msra.mxu1 %v3370_v32  ;;  %2629 = vmatprep.mubr.msk.f32.mxu1 %vm3196_vm1, %v3197_v1 }
 0x5ee   :  { %2597 = vmatmul.mubr.msk.f32.vlgmr.msra.gmra.mrb[4].mxu0 %vm99_vm0, %v505_v26  ;;  %2864 = vmatprep.subr.bf16.mxu1 %v3195_v0 }
 0x5ef   :  { %2857 = vmatpush3.bf16.msra.mxu0 %v3346_v5  ;;  %2618 = vmatprep.mubr.msk.f32.mxu0 %vm3196_vm1, %v3197_v1 }
 0x5f0   :  { %2858 = vmatprep.subr.bf16.mxu0 %v3195_v0 }
 0x5f1   :  { %2866 = vmatpush3.bf16.msra.mxu1 %v3373_v38 }
 0x5f2   :  { %2873 = vmatprep.subr.bf16.mxu1 %v3195_v0 }
 0x5f3   :  { %2860 = vmatpush3.bf16.msra.mxu0 %v3349_v7 }
 0x5f4   :  { %2867 = vmatprep.subr.bf16.mxu0 %v3195_v0 }
 0x5f6   :  { %2619 = vmatmul.mubr.msk.f32.vlgmr.msra.gmra.mrb[6].mxu0 %vm99_vm0, %v580_v25 }
 0x5f7   :  { %2869 = vmatpush3.bf16.msra.mxu0 %v3375_v39  ;;  %2640 = vmatprep.mubr.msk.f32.mxu0 %vm3196_vm1, %v3197_v1 }
 0x5f8   :  { %2870 = vmatprep.subr.bf16.mxu0 %v3195_v0 }
 0x5fb   :  { %2872 = vmatpush3.bf16.msra.mxu0 %v3379_v40 }
 0x5fc   :  { %2879 = vmatprep.subr.bf16.mxu0 %v3195_v0 }
 0x6bf   :  { %v649_v27 = vpop.f32.mrb[4].mxu1 }
 0x6c0   :  { %v2609_v28 = vpop.f32.mrb[5].mxu1 }
 0x6c1   :  { %v574_v29 = vpop.f32.mrb[4].mxu0 }
 0x6c2   :  { %v650_v30 = vadd.f32 %v649_v27, %v574_v29  ;;  %v2598_v31 = vpop.f32.mrb[5].mxu0 }
 0x6c4   :  { %v653_v33 = vadd.f32 %v3412_v49, %v650_v30 }
 0x6c6   :  { %v654_v34 = vmul.f32 %v653_v33, %v3357_v13 }
 0x6c8   :  { %2996 = vtanh.f32 %v654_v34 }
 0x6c9   :  { %v743_v36 = vpop.f32.mrb[6].mxu0 }
 0x6ca   :  { %v747_v37 = vadd.f32 %v743_v36, %v676_v35  ;;  %v2620_v41 = vpop.f32.mrb[7].mxu0 }
 0x6cc   :  { %v748_v42 = vmul.f32 %v747_v37, %v3357_v13 }
 0x6ce   :  { %2998 = vtanh.f32 %v748_v42 }
 0x6d2   :  { %v2997_v43 = vpop.eup %2996 }
 0x6d3   :  { %v656_v44 = vmul.f32 %v2997_v43, %v3357_v13 }
 0x6d5   :  { %v657_v45 = vadd.f32 %v656_v44, %v3360_v19 }
 0x6d7   :  { %660 = vrot.lane.b32.xlu0 %v657_v45, %s3199_s5  ;;  %v658_v54 = vmul.f32 %v657_v45, %v402_v17 }
 0x6d8   :  { %v2999_v46 = vpop.eup %2998 }
 0x6d9   :  { %v750_v47 = vmul.f32 %v2999_v46, %v3357_v13 }
 0x6db   :  { %v751_v48 = vadd.f32 %v750_v47, %v3360_v19 }
 0x6dd   :  { %754 = vrot.lane.b32.xlu1 %v751_v48, %s3199_s5  ;;  %v752_v57 = vmul.f32 %v751_v48, %v3427_v15 }
 0x749   :  { %v661_v50 = vpop.permute.xlu0 %660 }
 0x74a   :  { %v663_v51 = vmul.f32 %v661_v50, %v657_v45 }
 0x74c   :  { %665 = vrot.lane.b32.xlu0 %v663_v51, %s3200_s13 }
 0x74f   :  { %v755_v52 = vpop.permute.xlu1 %754 }
 0x750   :  { %v757_v53 = vmul.f32 %v755_v52, %v751_v48 }
 0x752   :  { %759 = vrot.lane.b32.xlu1 %v757_v53, %s3200_s13 }
 0x7be   :  { %v666_v55 = vpop.permute.xlu0 %665 }
 0x7bf   :  { %v3466_v56 = vadd.f32 %v666_v55, %v658_v54 }
 0x7c1   :  { %3000 = vtanh.f32 %v3466_v56 }
 0x7c4   :  { %v760_v58 = vpop.permute.xlu1 %759 }
 0x7c5   :  { %v762_v59 = vadd.f32 %v760_v58, %v752_v57  ;;  %v1208_v58 = vld [vmem:[#allocation6 + $0x20] sm:$0xff] }
 0x7c7   :  { %3002 = vtanh.f32 %v762_v59 }
 0x7cb   :  { %v3001_v60 = vpop.eup %3000 }
 0x7cc   :  { %671 = vrot.lane.b32.xlu0 %v3001_v60, %s3199_s5 }
 0x7d1   :  { %v3003_v61 = vpop.eup %3002 }
 0x7d2   :  { %765 = vrot.lane.b32.xlu1 %v3003_v61, %s3199_s5 }
 0x83e   :  { %v672_v62 = vpop.permute.xlu0 %671 }
 0x83f   :  { %v674_v63 = vmul.f32 %v672_v62, %v657_v45 }
 0x841   :  { %770 = vrot.lane.b32.xlu0 %v674_v63, %s3200_s13 }
 0x844   :  { %v766_v2 = vpop.permute.xlu1 %765 }
 0x845   :  { %v768_v3 = vmul.f32 %v766_v2, %v751_v48 }
 0x847   :  { %845 = vrot.lane.b32.xlu1 %v768_v3, %s3200_s13 }
 0x8b3   :  { %v771_v4 = vpop.permute.xlu0 %770 }
 0x8b4   :  { %2630 = vmatmul.mubr.msk.f32.vlgmr.msra.gmra.mrb[6].mxu1 %vm99_vm0, %v771_v4 }
 0x8b5   :  { %2875 = vmatpush3.bf16.msra.mxu1 %v3346_v5  ;;  %2651 = vmatprep.mubr.msk.f32.mxu1 %vm3196_vm1, %v3197_v1 }
 0x8b6   :  { %2876 = vmatprep.subr.bf16.mxu1 %v3195_v0 }
 0x8b9   :  { %2878 = vmatpush3.bf16.msra.mxu1 %v3349_v7  ;;  %v846_v6 = vpop.permute.xlu1 %845 }
 0x8ba   :  { %2641 = vmatmul.mubr.msk.f32.vlgmr.msra.gmra.mrb[8].mxu0 %vm99_vm0, %v846_v6  ;;  %2885 = vmatprep.subr.bf16.mxu1 %v3195_v0 }
 0x8bb   :  { %2881 = vmatpush3.bf16.msra.mxu0 %v3370_v32  ;;  %2662 = vmatprep.mubr.msk.f32.mxu0 %vm3196_vm1, %v3197_v1 }
 0x8bc   :  { %2652 = vmatmul.mubr.msk.f32.vlgmr.msra.gmra.mrb[8].mxu1 %vm99_vm0, %v846_v6  ;;  %2882 = vmatprep.subr.bf16.mxu0 %v3195_v0 }
 0x8bd   :  { %2887 = vmatpush3.bf16.msra.mxu1 %v3375_v39  ;;  %2673 = vmatprep.mubr.msk.f32.mxu1 %vm3196_vm1, %v3197_v1 }
 0x8be   :  { %2888 = vmatprep.subr.bf16.mxu1 %v3195_v0 }
 0x8bf   :  { %2884 = vmatpush3.bf16.msra.mxu0 %v3373_v38 }
 0x8c0   :  { %2891 = vmatprep.subr.bf16.mxu0 %v3195_v0 }
 0x8c1   :  { %2890 = vmatpush3.bf16.msra.mxu1 %v3379_v40 }
 0x8c2   :  { %2897 = vmatprep.subr.bf16.mxu1 %v3195_v0 }
 0x987   :  { %v840_v8 = vpop.f32.mrb[6].mxu1 }
 0x988   :  { %v2631_v9 = vpop.f32.mrb[7].mxu1 }
 0x98d   :  { %v915_v10 = vpop.f32.mrb[8].mxu0 }
 0x98e   :  { %v916_v12 = vadd.f32 %v915_v10, %v840_v8  ;;  %v2642_v14 = vpop.f32.mrb[9].mxu0 }
 0x98f   :  { %v1009_v15 = vpop.f32.mrb[8].mxu1 }
 0x990   :  { %v919_v16 = vadd.f32 %v3412_v49, %v916_v12  ;;  %v1013_v17 = vadd.f32 %v1009_v15, %v942_v11  ;;  %v2653_v18 = vpop.f32.mrb[9].mxu1 }
 0x992   :  { %v920_v20 = vmul.f32 %v919_v16, %v3357_v13  ;;  %v1014_v21 = vmul.f32 %v1013_v17, %v3357_v13 }
 0x994   :  { %3004 = vtanh.f32 %v920_v20 }
 0x995   :  { %3006 = vtanh.f32 %v1014_v21 }
 0x99e   :  { %v3005_v22 = vpop.eup %3004 }
 0x99f   :  { %v3007_v23 = vpop.eup %3006  ;;  %v922_v24 = vmul.f32 %v3005_v22, %v3357_v13 }
 0x9a0   :  { %v1016_v25 = vmul.f32 %v3007_v23, %v3357_v13 }
 0x9a1   :  { %v923_v26 = vadd.f32 %v922_v24, %v3360_v19 }
 0x9a2   :  { %v1017_v27 = vadd.f32 %v1016_v25, %v3360_v19 }
 0x9a3   :  { %926 = vrot.lane.b32.xlu0 %v923_v26, %s3199_s5  ;;  %v924_v33 = vmul.f32 %v923_v26, %v3466_v56 }
 0x9a4   :  { %1020 = vrot.lane.b32.xlu1 %v1017_v27, %s3199_s5  ;;  %v1018_v34 = vmul.f32 %v1017_v27, %v762_v59 }
 0xa15   :  { %v927_v28 = vpop.permute.xlu0 %926 }
 0xa16   :  { %v1021_v29 = vpop.permute.xlu1 %1020  ;;  %v929_v30 = vmul.f32 %v927_v28, %v923_v26 }
 0xa17   :  { %v1023_v31 = vmul.f32 %v1021_v29, %v1017_v27 }
 0xa18   :  { %931 = vrot.lane.b32.xlu0 %v929_v30, %s3200_s13 }
 0xa19   :  { %1025 = vrot.lane.b32.xlu1 %v1023_v31, %s3200_s13 }
 0xa8a   :  { %v932_v35 = vpop.permute.xlu0 %931 }
 0xa8b   :  { %v1026_v36 = vpop.permute.xlu1 %1025  ;;  %v934_v37 = vadd.f32 %v932_v35, %v924_v33  ;;  %v1474_v35 = vld [vmem:[#allocation6 + $0x28] sm:$0xff] }
 0xa8c   :  { %v3507_v41 = vadd.f32 %v1026_v36, %v1018_v34 }
 0xa8d   :  { %3008 = vtanh.f32 %v934_v37 }
 0xa8e   :  { %3010 = vtanh.f32 %v3507_v41 }
 0xa97   :  { %v3009_v42 = vpop.eup %3008 }
 0xa98   :  { %v3011_v43 = vpop.eup %3010  ;;  %937 = vrot.lane.b32.xlu0 %v3009_v42, %s3199_s5 }
 0xa99   :  { %1031 = vrot.lane.b32.xlu1 %v3011_v43, %s3199_s5 }
 0xb0a   :  { %v938_v44 = vpop.permute.xlu0 %937 }
 0xb0b   :  { %v1032_v45 = vpop.permute.xlu1 %1031  ;;  %v940_v46 = vmul.f32 %v938_v44, %v923_v26 }
 0xb0c   :  { %v1034_v47 = vmul.f32 %v1032_v45, %v1017_v27 }
 0xb0d   :  { %1036 = vrot.lane.b32.xlu0 %v940_v46, %s3200_s13 }
 0xb0e   :  { %1111 = vrot.lane.b32.xlu1 %v1034_v47, %s3200_s13 }
 0xb7f   :  { %v1037_v48 = vpop.permute.xlu0 %1036 }
 0xb80   :  { %v1112_v50 = vpop.permute.xlu1 %1111  ;;  %2663 = vmatmul.mubr.msk.f32.vlgmr.msra.gmra.mrb[10].mxu0 %vm99_vm0, %v1037_v48 }
 0xb81   :  { %2674 = vmatmul.mubr.msk.f32.vlgmr.msra.gmra.mrb[10].mxu1 %vm99_vm0, %v1112_v50  ;;  %2893 = vmatpush3.bf16.msra.mxu0 %v3346_v5 }
 0xb82   :  { %2894 = vmatprep.subr.bf16.mxu0 %v3195_v0  ;;  %2684 = vmatprep.mubr.msk.f32.mxu0 %vm3196_vm1, %v3197_v1 }
 0xb83   :  { %2899 = vmatpush3.bf16.msra.mxu1 %v3370_v32  ;;  %2695 = vmatprep.mubr.msk.f32.mxu1 %vm3196_vm1, %v3197_v1 }
 0xb84   :  { %2900 = vmatprep.subr.bf16.mxu1 %v3195_v0 }
 0xb85   :  { %2896 = vmatpush3.bf16.msra.mxu0 %v3349_v7 }
 0xb86   :  { %2903 = vmatprep.subr.bf16.mxu0 %v3195_v0 }
 0xb87   :  { %2902 = vmatpush3.bf16.msra.mxu1 %v3373_v38 }
 0xb88   :  { %2685 = vmatmul.mubr.msk.f32.vlgmr.msra.gmra.mrb[12].mxu0 %vm99_vm0, %v1112_v50  ;;  %2909 = vmatprep.subr.bf16.mxu1 %v3195_v0 }
 0xb89   :  { %2905 = vmatpush3.bf16.msra.mxu0 %v3375_v39  ;;  %2706 = vmatprep.mubr.msk.f32.mxu0 %vm3196_vm1, %v3197_v1 }
 0xb8a   :  { %2906 = vmatprep.subr.bf16.mxu0 %v3195_v0 }
 0xb8d   :  { %2908 = vmatpush3.bf16.msra.mxu0 %v3379_v40 }
 0xb8e   :  { %2915 = vmatprep.subr.bf16.mxu0 %v3195_v0 }
 0xc53   :  { %v1106_v51 = vpop.f32.mrb[10].mxu0 }
 0xc54   :  { %v1181_v52 = vpop.f32.mrb[10].mxu1  ;;  %v2664_v53 = vpop.f32.mrb[11].mxu0 }
 0xc55   :  { %v1182_v54 = vadd.f32 %v1181_v52, %v1106_v51  ;;  %v2675_v55 = vpop.f32.mrb[11].mxu1 }
 0xc57   :  { %v1185_v56 = vadd.f32 %v3412_v49, %v1182_v54 }
 0xc59   :  { %v1186_v57 = vmul.f32 %v1185_v56, %v3357_v13 }
 0xc5b   :  { %3012 = vtanh.f32 %v1186_v57  ;;  %v1275_v59 = vpop.f32.mrb[12].mxu0 }
 0xc5c   :  { %v1279_v60 = vadd.f32 %v1275_v59, %v1208_v58  ;;  %v2686_v61 = vpop.f32.mrb[13].mxu0 }
 0xc5e   :  { %v1280_v62 = vmul.f32 %v1279_v60, %v3357_v13 }
 0xc60   :  { %3014 = vtanh.f32 %v1280_v62 }
 0xc65   :  { %v3013_v63 = vpop.eup %3012 }
 0xc66   :  { %v1188_v2 = vmul.f32 %v3013_v63, %v3357_v13 }
 0xc68   :  { %v1189_v3 = vadd.f32 %v1188_v2, %v3360_v19 }
 0xc6a   :  { %v3015_v4 = vpop.eup %3014  ;;  %1192 = vrot.lane.b32.xlu0 %v1189_v3, %s3199_s5  ;;  %v1190_v14 = vmul.f32 %v1189_v3, %v934_v37 }
 0xc6b   :  { %v1282_v6 = vmul.f32 %v3015_v4, %v3357_v13 }
 0xc6d   :  { %v1283_v8 = vadd.f32 %v1282_v6, %v3360_v19 }
 0xc6f   :  { %1286 = vrot.lane.b32.xlu1 %v1283_v8, %s3199_s5  ;;  %v1284_v17 = vmul.f32 %v1283_v8, %v3507_v41 }
 0xcdc   :  { %v1193_v9 = vpop.permute.xlu0 %1192 }
 0xcdd   :  { %v1195_v10 = vmul.f32 %v1193_v9, %v1189_v3 }
 0xcdf   :  { %1197 = vrot.lane.b32.xlu0 %v1195_v10, %s3200_s13 }
 0xce1   :  { %v1287_v11 = vpop.permute.xlu1 %1286 }
 0xce2   :  { %v1289_v12 = vmul.f32 %v1287_v11, %v1283_v8 }
 0xce4   :  { %1291 = vrot.lane.b32.xlu1 %v1289_v12, %s3200_s13 }
 0xd51   :  { %v1198_v15 = vpop.permute.xlu0 %1197 }
 0xd52   :  { %v3546_v16 = vadd.f32 %v1198_v15, %v1190_v14 }
 0xd54   :  { %3016 = vtanh.f32 %v3546_v16 }
 0xd56   :  { %v1292_v18 = vpop.permute.xlu1 %1291 }
 0xd57   :  { %v1294_v20 = vadd.f32 %v1292_v18, %v1284_v17  ;;  %v1740_v18 = vld [vmem:[#allocation6 + $0x30] sm:$0xff] }
 0xd59   :  { %3018 = vtanh.f32 %v1294_v20 }
 0xd5e   :  { %v3017_v21 = vpop.eup %3016 }
 0xd5f   :  { %1203 = vrot.lane.b32.xlu0 %v3017_v21, %s3199_s5 }
 0xd63   :  { %v3019_v22 = vpop.eup %3018 }
 0xd64   :  { %1297 = vrot.lane.b32.xlu1 %v3019_v22, %s3199_s5 }
 0xdd1   :  { %v1204_v23 = vpop.permute.xlu0 %1203 }
 0xdd2   :  { %v1206_v24 = vmul.f32 %v1204_v23, %v1189_v3 }
 0xdd4   :  { %1302 = vrot.lane.b32.xlu0 %v1206_v24, %s3200_s13 }
 0xdd6   :  { %v1298_v25 = vpop.permute.xlu1 %1297 }
 0xdd7   :  { %v1300_v26 = vmul.f32 %v1298_v25, %v1283_v8 }
 0xdd9   :  { %1377 = vrot.lane.b32.xlu1 %v1300_v26, %s3200_s13 }
 0xe46   :  { %v1303_v27 = vpop.permute.xlu0 %1302 }
 0xe47   :  { %2696 = vmatmul.mubr.msk.f32.vlgmr.msra.gmra.mrb[12].mxu1 %vm99_vm0, %v1303_v27 }
 0xe48   :  { %2911 = vmatpush3.bf16.msra.mxu1 %v3346_v5  ;;  %2717 = vmatprep.mubr.msk.f32.mxu1 %vm3196_vm1, %v3197_v1 }
 0xe49   :  { %2912 = vmatprep.subr.bf16.mxu1 %v3195_v0 }
 0xe4b   :  { %v1378_v28 = vpop.permute.xlu1 %1377 }
 0xe4c   :  { %2914 = vmatpush3.bf16.msra.mxu1 %v3349_v7  ;;  %2707 = vmatmul.mubr.msk.f32.vlgmr.msra.gmra.mrb[14].mxu0 %vm99_vm0, %v1378_v28 }
 0xe4d   :  { %2917 = vmatpush3.bf16.msra.mxu0 %v3370_v32  ;;  %2921 = vmatprep.subr.bf16.mxu1 %v3195_v0 }
 0xe4e   :  { %2918 = vmatprep.subr.bf16.mxu0 %v3195_v0  ;;  %2728 = vmatprep.mubr.msk.f32.mxu0 %vm3196_vm1, %v3197_v1 }
 0xe4f   :  { %2718 = vmatmul.mubr.msk.f32.vlgmr.msra.gmra.mrb[14].mxu1 %vm99_vm0, %v1378_v28 }
 0xe50   :  { %2923 = vmatpush3.bf16.msra.mxu1 %v3375_v39  ;;  %2739 = vmatprep.mubr.msk.f32.mxu1 %vm3196_vm1, %v3197_v1 }
 0xe51   :  { %2920 = vmatpush3.bf16.msra.mxu0 %v3373_v38  ;;  %2924 = vmatprep.subr.bf16.mxu1 %v3195_v0 }
 0xe52   :  { %2927 = vmatprep.subr.bf16.mxu0 %v3195_v0 }
 0xe54   :  { %2926 = vmatpush3.bf16.msra.mxu1 %v3379_v40 }
 0xe55   :  { %2933 = vmatprep.subr.bf16.mxu1 %v3195_v0 }
 0xf1a   :  { %v1372_v29 = vpop.f32.mrb[12].mxu1 }
 0xf1b   :  { %v2697_v30 = vpop.f32.mrb[13].mxu1 }
 0xf1f   :  { %v1447_v31 = vpop.f32.mrb[14].mxu0 }
 0xf20   :  { %v1448_v33 = vadd.f32 %v1447_v31, %v1372_v29  ;;  %v2708_v34 = vpop.f32.mrb[15].mxu0 }
 0xf22   :  { %v1451_v36 = vadd.f32 %v3412_v49, %v1448_v33  ;;  %v1541_v37 = vpop.f32.mrb[14].mxu1 }
 0xf23   :  { %v1545_v41 = vadd.f32 %v1541_v37, %v1474_v35  ;;  %v2719_v42 = vpop.f32.mrb[15].mxu1 }
 0xf24   :  { %v1452_v43 = vmul.f32 %v1451_v36, %v3357_v13 }
 0xf25   :  { %v1546_v44 = vmul.f32 %v1545_v41, %v3357_v13 }
 0xf26   :  { %3020 = vtanh.f32 %v1452_v43 }
 0xf27   :  { %3022 = vtanh.f32 %v1546_v44 }
 0xf30   :  { %v3021_v45 = vpop.eup %3020 }
 0xf31   :  { %v3023_v46 = vpop.eup %3022  ;;  %v1454_v47 = vmul.f32 %v3021_v45, %v3357_v13 }
 0xf32   :  { %v1548_v48 = vmul.f32 %v3023_v46, %v3357_v13 }
 0xf33   :  { %v1455_v50 = vadd.f32 %v1454_v47, %v3360_v19 }
 0xf34   :  { %v1549_v51 = vadd.f32 %v1548_v48, %v3360_v19 }
 0xf35   :  { %1458 = vrot.lane.b32.xlu0 %v1455_v50, %s3199_s5  ;;  %v1456_v56 = vmul.f32 %v1455_v50, %v3546_v16 }
 0xf36   :  { %1552 = vrot.lane.b32.xlu1 %v1549_v51, %s3199_s5  ;;  %v1550_v57 = vmul.f32 %v1549_v51, %v1294_v20 }
 0xfa7   :  { %v1459_v52 = vpop.permute.xlu0 %1458 }
 0xfa8   :  { %v1553_v53 = vpop.permute.xlu1 %1552  ;;  %v1461_v54 = vmul.f32 %v1459_v52, %v1455_v50 }
 0xfa9   :  { %v1555_v55 = vmul.f32 %v1553_v53, %v1549_v51 }
 0xfaa   :  { %1463 = vrot.lane.b32.xlu0 %v1461_v54, %s3200_s13 }
 0xfab   :  { %1557 = vrot.lane.b32.xlu1 %v1555_v55, %s3200_s13  ;;  %v2006_v55 = vld [vmem:[#allocation6 + $0x38] sm:$0xff] }
0x101c   :  { %v1464_v58 = vpop.permute.xlu0 %1463 }
0x101d   :  { %v1558_v59 = vpop.permute.xlu1 %1557  ;;  %v1466_v60 = vadd.f32 %v1464_v58, %v1456_v56 }
0x101e   :  { %v3587_v61 = vadd.f32 %v1558_v59, %v1550_v57 }
0x101f   :  { %3024 = vtanh.f32 %v1466_v60 }
0x1020   :  { %3026 = vtanh.f32 %v3587_v61 }
0x1029   :  { %v3025_v62 = vpop.eup %3024 }
0x102a   :  { %v3027_v63 = vpop.eup %3026  ;;  %1469 = vrot.lane.b32.xlu0 %v3025_v62, %s3199_s5 }
0x102b   :  { %1563 = vrot.lane.b32.xlu1 %v3027_v63, %s3199_s5 }
0x109c   :  { %v1470_v2 = vpop.permute.xlu0 %1469 }
0x109d   :  { %v1564_v3 = vpop.permute.xlu1 %1563  ;;  %v1472_v4 = vmul.f32 %v1470_v2, %v1455_v50 }
0x109e   :  { %v1566_v6 = vmul.f32 %v1564_v3, %v1549_v51 }
0x109f   :  { %1568 = vrot.lane.b32.xlu0 %v1472_v4, %s3200_s13 }
0x10a0   :  { %1643 = vrot.lane.b32.xlu1 %v1566_v6, %s3200_s13 }
0x1111   :  { %v1569_v8 = vpop.permute.xlu0 %1568 }
0x1112   :  { %v1644_v9 = vpop.permute.xlu1 %1643  ;;  %2729 = vmatmul.mubr.msk.f32.vlgmr.msra.gmra.mrb[16].mxu0 %vm99_vm0, %v1569_v8 }
0x1113   :  { %2740 = vmatmul.mubr.msk.f32.vlgmr.msra.gmra.mrb[16].mxu1 %vm99_vm0, %v1644_v9  ;;  %2929 = vmatpush3.bf16.msra.mxu0 %v3346_v5 }
0x1114   :  { %2930 = vmatprep.subr.bf16.mxu0 %v3195_v0  ;;  %2750 = vmatprep.mubr.msk.f32.mxu0 %vm3196_vm1, %v3197_v1 }
0x1115   :  { %2935 = vmatpush3.bf16.msra.mxu1 %v3370_v32  ;;  %2761 = vmatprep.mubr.msk.f32.mxu1 %vm3196_vm1, %v3197_v1 }
0x1116   :  { %2936 = vmatprep.subr.bf16.mxu1 %v3195_v0 }
0x1117   :  { %2932 = vmatpush3.bf16.msra.mxu0 %v3349_v7 }
0x1118   :  { %2939 = vmatprep.subr.bf16.mxu0 %v3195_v0 }
0x1119   :  { %2938 = vmatpush3.bf16.msra.mxu1 %v3373_v38 }
0x111a   :  { %2751 = vmatmul.mubr.msk.f32.vlgmr.msra.gmra.mrb[18].mxu0 %vm99_vm0, %v1644_v9  ;;  %2945 = vmatprep.subr.bf16.mxu1 %v3195_v0 }
0x111b   :  { %2941 = vmatpush3.bf16.msra.mxu0 %v3375_v39  ;;  %2772 = vmatprep.mubr.msk.f32.mxu0 %vm3196_vm1, %v3197_v1 }
0x111c   :  { %2942 = vmatprep.subr.bf16.mxu0 %v3195_v0 }
0x111f   :  { %2944 = vmatpush3.bf16.msra.mxu0 %v3379_v40 }
0x1120   :  { %2951 = vmatprep.subr.bf16.mxu0 %v3195_v0 }
0x11e5   :  { %v1638_v10 = vpop.f32.mrb[16].mxu0 }
0x11e6   :  { %v1713_v11 = vpop.f32.mrb[16].mxu1  ;;  %v2730_v12 = vpop.f32.mrb[17].mxu0 }
0x11e7   :  { %v1714_v14 = vadd.f32 %v1713_v11, %v1638_v10  ;;  %v2741_v15 = vpop.f32.mrb[17].mxu1 }
0x11e9   :  { %v1717_v16 = vadd.f32 %v3412_v49, %v1714_v14 }
0x11eb   :  { %v1718_v17 = vmul.f32 %v1717_v16, %v3357_v13 }
0x11ed   :  { %3028 = vtanh.f32 %v1718_v17  ;;  %v1807_v20 = vpop.f32.mrb[18].mxu0 }
0x11ee   :  { %v1811_v21 = vadd.f32 %v1807_v20, %v1740_v18  ;;  %v2752_v22 = vpop.f32.mrb[19].mxu0 }
0x11f0   :  { %v1812_v23 = vmul.f32 %v1811_v21, %v3357_v13 }
0x11f2   :  { %3030 = vtanh.f32 %v1812_v23 }
0x11f7   :  { %v3029_v24 = vpop.eup %3028 }
0x11f8   :  { %v1720_v25 = vmul.f32 %v3029_v24, %v3357_v13 }
0x11fa   :  { %v1721_v26 = vadd.f32 %v1720_v25, %v3360_v19 }
0x11fc   :  { %v3031_v27 = vpop.eup %3030  ;;  %1724 = vrot.lane.b32.xlu0 %v1721_v26, %s3199_s5  ;;  %v1722_v35 = vmul.f32 %v1721_v26, %v1466_v60 }
0x11fd   :  { %v1814_v28 = vmul.f32 %v3031_v27, %v3357_v13 }
0x11ff   :  { %v1815_v29 = vadd.f32 %v1814_v28, %v3360_v19 }
0x1201   :  { %1818 = vrot.lane.b32.xlu1 %v1815_v29, %s3199_s5  ;;  %v1816_v41 = vmul.f32 %v1815_v29, %v3587_v61 }
0x126e   :  { %v1725_v30 = vpop.permute.xlu0 %1724 }
0x126f   :  { %v1727_v31 = vmul.f32 %v1725_v30, %v1721_v26 }
0x1271   :  { %1729 = vrot.lane.b32.xlu0 %v1727_v31, %s3200_s13 }
0x1273   :  { %v1819_v33 = vpop.permute.xlu1 %1818 }
0x1274   :  { %v1821_v34 = vmul.f32 %v1819_v33, %v1815_v29 }
0x1276   :  { %1823 = vrot.lane.b32.xlu1 %v1821_v34, %s3200_s13 }
0x12e3   :  { %v1730_v36 = vpop.permute.xlu0 %1729 }
0x12e4   :  { %v3626_v37 = vadd.f32 %v1730_v36, %v1722_v35 }
0x12e6   :  { %3032 = vtanh.f32 %v3626_v37 }
0x12e8   :  { %v1824_v42 = vpop.permute.xlu1 %1823 }
0x12e9   :  { %v1826_v43 = vadd.f32 %v1824_v42, %v1816_v41 }
0x12eb   :  { %3034 = vtanh.f32 %v1826_v43 }
0x12f0   :  { %v3033_v44 = vpop.eup %3032 }
0x12f1   :  { %1735 = vrot.lane.b32.xlu0 %v3033_v44, %s3199_s5  ;;  %v2293_v44 = vld [vmem:[#allocation14 + $0x10] sm:$0xff] }
0x12f5   :  { %v3035_v45 = vpop.eup %3034 }
0x12f6   :  { %1829 = vrot.lane.b32.xlu1 %v3035_v45, %s3199_s5 }
0x1363   :  { %v1736_v46 = vpop.permute.xlu0 %1735 }
0x1364   :  { %v1738_v47 = vmul.f32 %v1736_v46, %v1721_v26  ;;  %v2294_v46 = vld [vmem:[#allocation14 + $0x18] sm:$0xff] }
0x1366   :  { %1834 = vrot.lane.b32.xlu0 %v1738_v47, %s3200_s13  ;;  %v2967_v47 = vpack.c.bf16 %v2294_v46, %v2293_v44 }
0x1368   :  { %v1830_v48 = vpop.permute.xlu1 %1829 }
0x1369   :  { %v1832_v50 = vmul.f32 %v1830_v48, %v1815_v29 }
0x136b   :  { %1909 = vrot.lane.b32.xlu1 %v1832_v50, %s3200_s13 }
0x13d8   :  { %v1835_v51 = vpop.permute.xlu0 %1834 }
0x13d9   :  { %2762 = vmatmul.mubr.msk.f32.vlgmr.msra.gmra.mrb[18].mxu1 %vm99_vm0, %v1835_v51 }
0x13da   :  { %2947 = vmatpush3.bf16.msra.mxu1 %v3346_v5  ;;  %2783 = vmatprep.mubr.msk.f32.mxu1 %vm3196_vm1, %v3197_v1 }
0x13db   :  { %2948 = vmatprep.subr.bf16.mxu1 %v3195_v0 }
0x13dd   :  { %v1910_v52 = vpop.permute.xlu1 %1909 }
0x13de   :  { %2950 = vmatpush3.bf16.msra.mxu1 %v3349_v7  ;;  %2773 = vmatmul.mubr.msk.f32.vlgmr.msra.gmra.mrb[20].mxu0 %vm99_vm0, %v1910_v52 }
0x13df   :  { %2957 = vmatprep.subr.bf16.mxu1 %v3195_v0  ;;  %2953 = vmatpush3.bf16.msra.mxu0 %v3370_v32 }
0x13e0   :  { %2954 = vmatprep.subr.bf16.mxu0 %v3195_v0  ;;  %2794 = vmatprep.mubr.msk.f32.mxu0 %vm3196_vm1, %v3197_v1 }
0x13e1   :  { %2784 = vmatmul.mubr.msk.f32.vlgmr.msra.gmra.mrb[20].mxu1 %vm99_vm0, %v1910_v52  ;;  %v2417_v52 = vld [vmem:[%s3709_s6] ss:$0 sm:$0xff] }
0x13e2   :  { %2959 = vmatpush3.bf16.msra.mxu1 %v3375_v39  ;;  %2805 = vmatprep.mubr.msk.f32.mxu1 %vm3196_vm1, %v3197_v1 }
0x13e3   :  { %2960 = vmatprep.subr.bf16.mxu1 %v3195_v0  ;;  %2956 = vmatpush3.bf16.msra.mxu0 %v3373_v38 }
0x13e4   :  { %2963 = vmatprep.subr.bf16.mxu0 %v3195_v0 }
0x13e6   :  { %2962 = vmatpush3.bf16.msra.mxu1 %v3379_v40 }
0x14ac   :  { %v1904_v5 = vpop.f32.mrb[18].mxu1 }
0x14ad   :  { %v2763_v7 = vpop.f32.mrb[19].mxu1 }
0x14b1   :  { %v1979_v32 = vpop.f32.mrb[20].mxu0 }
0x14b2   :  { %v1980_v53 = vadd.f32 %v1979_v32, %v1904_v5  ;;  %v2774_v54 = vpop.f32.mrb[21].mxu0 }
0x14b4   :  { %v1983_v56 = vadd.f32 %v3412_v49, %v1980_v53  ;;  %v2073_v39 = vpop.f32.mrb[20].mxu1 }
0x14b5   :  { %v2077_v57 = vadd.f32 %v2073_v39, %v2006_v55  ;;  %v2785_v58 = vpop.f32.mrb[21].mxu1 }
0x14b6   :  { %v1984_v59 = vmul.f32 %v1983_v56, %v3357_v13 }
0x14b7   :  { %v2078_v60 = vmul.f32 %v2077_v57, %v3357_v13 }
0x14b8   :  { %3036 = vtanh.f32 %v1984_v59 }
0x14b9   :  { %3038 = vtanh.f32 %v2078_v60 }
0x14c2   :  { %v3037_v38 = vpop.eup %3036 }
0x14c3   :  { %v3039_v61 = vpop.eup %3038  ;;  %v1986_v40 = vmul.f32 %v3037_v38, %v3357_v13 }
0x14c4   :  { %v2080_v62 = vmul.f32 %v3039_v61, %v3357_v13 }
0x14c5   :  { %v1987_v63 = vadd.f32 %v1986_v40, %v3360_v19 }
0x14c6   :  { %v2081_v2 = vadd.f32 %v2080_v62, %v3360_v19 }
0x14c7   :  { %1990 = vrot.lane.b32.xlu0 %v1987_v63, %s3199_s5  ;;  %v1988_v9 = vmul.f32 %v1987_v63, %v3626_v37 }
0x14c8   :  { %2084 = vrot.lane.b32.xlu1 %v2081_v2, %s3199_s5  ;;  %v2082_v10 = vmul.f32 %v2081_v2, %v1826_v43  ;;  %v2291_v43 = vld [vmem:[#allocation14] sm:$0xff] }
0x1539   :  { %v1991_v3 = vpop.permute.xlu0 %1990 }
0x153a   :  { %v2085_v4 = vpop.permute.xlu1 %2084  ;;  %v1993_v6 = vmul.f32 %v1991_v3, %v1987_v63 }
0x153b   :  { %v2087_v8 = vmul.f32 %v2085_v4, %v2081_v2 }
0x153c   :  { %1995 = vrot.lane.b32.xlu0 %v1993_v6, %s3200_s13 }
0x153d   :  { %2089 = vrot.lane.b32.xlu1 %v2087_v8, %s3200_s13 }
0x15ae   :  { %v1996_v11 = vpop.permute.xlu0 %1995 }
0x15af   :  { %v2090_v12 = vpop.permute.xlu1 %2089  ;;  %v1998_v14 = vadd.f32 %v1996_v11, %v1988_v9 }
0x15b0   :  { %v2092_v15 = vadd.f32 %v2090_v12, %v2082_v10 }
0x15b1   :  { %3040 = vtanh.f32 %v1998_v14 }
0x15b2   :  { %3042 = vtanh.f32 %v2092_v15 }
0x15bb   :  { %v3041_v16 = vpop.eup %3040 }
0x15bc   :  { %v3043_v17 = vpop.eup %3042  ;;  %2001 = vrot.lane.b32.xlu0 %v3041_v16, %s3199_s5 }
0x15bd   :  { %2095 = vrot.lane.b32.xlu1 %v3043_v17, %s3199_s5 }
0x162e   :  { %v2002_v18 = vpop.permute.xlu0 %2001 }
0x162f   :  { %v2096_v20 = vpop.permute.xlu1 %2095  ;;  %v2004_v21 = vmul.f32 %v2002_v18, %v1987_v63 }
0x1630   :  { %v2098_v22 = vmul.f32 %v2096_v20, %v2081_v2 }
0x1631   :  { %2100 = vrot.lane.b32.xlu0 %v2004_v21, %s3200_s13 }
0x1632   :  { %2175 = vrot.lane.b32.xlu1 %v2098_v22, %s3200_s13 }
0x16a3   :  { %v2101_v23 = vpop.permute.xlu0 %2100 }
0x16a4   :  { %v2176_v24 = vpop.permute.xlu1 %2175  ;;  %2795 = vmatmul.mubr.msk.f32.vlgmr.msra.gmra.mrb[22].mxu0 %vm99_vm0, %v2101_v23 }
0x16a5   :  { %2272 = vst.msk [vmem:[#allocation2] sm:$0xff] %vm99_vm0, %v2176_v24  ;;  %2806 = vmatmul.mubr.msk.f32.vlgmr.msra.gmra.mrb[22].mxu1 %vm99_vm0, %v2176_v24  ;;  %2816 = vmatprep.mubr.msk.f32.mxu0 %vm3196_vm1, %v3197_v1 }
0x1777   :  { %v2170_v25 = vpop.f32.mrb[22].mxu0 }
0x1778   :  { %v2245_v26 = vpop.f32.mrb[22].mxu1  ;;  %v2796_v27 = vpop.f32.mrb[23].mxu0 }
0x1779   :  { %v2246_v28 = vadd.f32 %v2245_v26, %v2170_v25  ;;  %v2807_v29 = vpop.f32.mrb[23].mxu1 }
0x177b   :  { %v2249_v30 = vadd.f32 %v3412_v49, %v2246_v28  ;;  %v2292_v49 = vld [vmem:[#allocation14 + $0x8] sm:$0xff] }
0x177c   :  { %v2964_v45 = vpack.c.bf16 %v2292_v49, %v2291_v43 }
0x177d   :  { %v2250_v31 = vmul.f32 %v2249_v30, %v3357_v13 }
0x177e   :  { %2965 = vmatpush3.bf16.msra.mxu0 %v2964_v45 }
0x177f   :  { %3044 = vtanh.f32 %v2250_v31  ;;  %2966 = vmatprep.subr.bf16.mxu0 %v3195_v0 }
0x1782   :  { %2968 = vmatpush3.bf16.msra.mxu0 %v2967_v47 }
0x1789   :  { %v3045_v33 = vpop.eup %3044 }
0x178a   :  { %v2252_v34 = vmul.f32 %v3045_v33, %v3357_v13 }
0x178c   :  { %v2253_v35 = vadd.f32 %v2252_v34, %v3360_v19 }
0x178e   :  { %2256 = vrot.lane.b32.xlu0 %v2253_v35, %s3199_s5  ;;  %v2254_v1 = vmul.f32 %v2253_v35, %v1998_v14 }
0x1800   :  { %v2257_v36 = vpop.permute.xlu0 %2256 }
0x1801   :  { %v2259_v37 = vmul.f32 %v2257_v36, %v2253_v35 }
0x1803   :  { %2261 = vrot.lane.b32.xlu1 %v2259_v37, %s3200_s13 }
0x1875   :  { %v2262_v41 = vpop.permute.xlu1 %2261 }
0x1876   :  { %v2264_v42 = vadd.f32 %v2262_v41, %v2254_v1 }
0x1878   :  { %3046 = vtanh.f32 %v2264_v42 }
0x1882   :  { %v3047_v13 = vpop.eup %3046 }
0x1883   :  { %2267 = vrot.lane.b32.xlu0 %v3047_v13, %s3199_s5 }
0x1887   :  { %2274 = vrot.lane.b32.xlu0 %v2092_v15, %s3201_s4 }
0x18f5   :  { %v2268_v19 = vpop.permute.xlu0 %2267 }
0x18f6   :  { %v2270_v48 = vmul.f32 %v2268_v19, %v2253_v35 }
0x18f8   :  { %2279 = vrot.lane.b32.xlu1 %v2270_v48, %s3200_s13 }
0x18f9   :  { %v2275_v50 = vpop.permute.xlu0 %2274 }
0x18fa   :  { %2277 = vst.msk [vmem:[#allocation4] sm:$0xff] %vm99_vm0, %v2275_v50 }
0x18fc   :  { %2284 = vrot.lane.b32.xlu1 %v2264_v42, %s3201_s4 }
0x196a   :  { %v2280_v51 = vpop.permute.xlu1 %2279 }
0x196b   :  { %2282 = vst.msk [vmem:[#allocation3] sm:$0xff] %vm99_vm0, %v2280_v51  ;;  %2817 = vmatmul.mubr.msk.f32.vlgmr.msra.gmra.mrb[24].mxu0 %vm99_vm0, %v2280_v51 }
0x196e   :  { %v2285_v0 = vpop.permute.xlu1 %2284 }
0x196f   :  { %2287 = vst.msk [vmem:[#allocation5] sm:$0xff] %vm99_vm0, %v2285_v0 }
0x1a3e   :  { %v2370_v5 = vpop.f32.mrb[24].mxu0 }
0x1a3f   :  { %v2371_v7 = vadd.f32 %v2417_v52, %v2370_v5  ;;  %v2818_v32 = vpop.f32.mrb[25].mxu0 }
0x1a41   :  { %2374 = vst [vmem:[#allocation15] sm:$0xff] %v2371_v7 }
0x1a42   :  { %3169 = shalt.err (!%p3166_p2)
}
0x1a43   :  { %s3170_s23 = scalar_lea.hbm %s3710_s7, 128 }
0x1a44   :  { %p3171_p3 = scmp.ne.s32.totalorder %s3710_s7, %s3170_s23  ;;  %p3174_p4 = scmp.lt.u32.totalorder %s3170_s23, %s3710_s7 }
0x1a46   :  { %p3176_p5 = pnand %p3174_p4, %p3171_p3 }
0x1a48   :  { %3179 = shalt.err (!%p3176_p5)
}
0x1a49   :  { %2384 = dma.vmem_to_hbm [thread:$0]  %s2382_s19, 128, %s3710_s7, [#allocation8]  }
0x1a4a   :  { %3186 = dma.done.wait [#allocation8], 128  }
0x1a4b   :  { %3187 = vsyncadd [#allocation8], 4294967168 }
0x1a4c   :  { %2388 = vsyncpa [#allocation7], 1 }
0x1a4d   :  { %2389 = vsyncpa [#allocation10], 1 }
0x1a4e   :  { %2390 = vsyncpa [#allocation13], 1 }
0x1a4f   :  { %2391 = vsyncpa [#allocation8], 1 }

</bundles_post_ra>
